<compile_context>
chip_gen: v6e
topology: v6e:2x2x1
jax: 0.10.0
libtpu: 0.0.40
codegen_flags: <defaults>
</compile_context>

<pallas_src>
import functools
import math

import jax
import jax.numpy as jnp
import numpy as np
from jax.experimental import pallas as pl
from jax.experimental.pallas import tpu as pltpu


def _get_p_n(num_param):
    """Fixed kernel-sample offsets p_n; matches AKConv._get_p_n (meshgrid 'ij')."""
    base_int = round(math.sqrt(num_param))
    row_number = num_param // base_int
    mod_number = num_param % base_int
    p_n_x, p_n_y = [], []
    for r in range(row_number):
        for c in range(base_int):
            p_n_x.append(r)
            p_n_y.append(c)
    for c in range(mod_number):
        p_n_x.append(row_number)
        p_n_y.append(c)
    return np.asarray(p_n_x, np.float32), np.asarray(p_n_y, np.float32)


def _make_kernel(C, N, outc, H, W, HW_out):
    def kernel(x_ref, off_ref, pbx_ref, pby_ref, wc2_ref, bns_ref, bnt_ref,
               o_ref, xoff_scr):
        f32 = jnp.float32

        # source image as (C*H, W): lanes = source columns (hoisted out of the loop)
        x2 = x_ref[...].reshape(C * H, W)

        # iotas for the weighted one-hot row/col factors (hoisted; JAX does not
        # CSE broadcast_in_dim inside the loop)
        h_iota = jax.lax.broadcasted_iota(jnp.int32, (H, HW_out), 0)
        w_iota = jax.lax.broadcasted_iota(jnp.int32, (W, HW_out), 0)

        def body(n, carry):
            # sampling position p = p_0 + p_n + offset for sample n, (1, HW_out)
            p_x = pbx_ref[pl.ds(n, 1), :] + off_ref[pl.ds(n, 1), :]
            p_y = pby_ref[pl.ds(n, 1), :] + off_ref[pl.ds(N + n, 1), :]

            fl_x = jnp.floor(p_x)
            fl_y = jnp.floor(p_y)
            lt_x = jnp.clip(fl_x, 0.0, float(H - 1))
            rb_x = jnp.clip(fl_x + 1.0, 0.0, float(H - 1))
            lt_y = jnp.clip(fl_y, 0.0, float(W - 1))
            rb_y = jnp.clip(fl_y + 1.0, 0.0, float(W - 1))
            pcx = jnp.clip(p_x, 0.0, float(H - 1))
            pcy = jnp.clip(p_y, 0.0, float(W - 1))

            # separable bilinear gates: g_lt = ax_lt*ay_lt, g_rb = ax_rb*ay_rb,
            # g_lb = ax_lt*ay_rb, g_rt = ax_rb*ay_lt  (exactly the module's gates)
            ax_lt = 1.0 + (lt_x - pcx)
            ax_rb = 1.0 - (rb_x - pcx)
            ay_lt = 1.0 + (lt_y - pcy)
            ay_rb = 1.0 - (rb_y - pcy)

            i_ltx = lt_x.astype(jnp.int32)
            i_rbx = rb_x.astype(jnp.int32)
            i_lty = lt_y.astype(jnp.int32)
            i_rby = rb_y.astype(jnp.int32)

            # weighted one-hot factors: row_f (H, HW_out), col_f (W, HW_out)
            row_f = (jnp.where(h_iota == i_ltx, ax_lt, 0.0)
                     + jnp.where(h_iota == i_rbx, ax_rb, 0.0))
            col_f = (jnp.where(w_iota == i_lty, ay_lt, 0.0)
                     + jnp.where(w_iota == i_rby, ay_rb, 0.0))

            # column gather + y-blend on the MXU, row gather + x-blend as a
            # sublane-weighted reduction (VPU/XLU)
            z = jnp.dot(x2, col_f, preferred_element_type=f32)     # (C*H, HW_out)
            z = z.reshape(C, H, HW_out)
            xoff_scr[n] = jnp.sum(z * row_f[None, :, :], axis=1)   # (C, HW_out)
            return carry

        jax.lax.fori_loop(0, N, body, 0, unroll=True)

        # main (num_param,1)/(num_param,1) conv as ONE stacked matmul over (n, c)
        xoff = xoff_scr[...].reshape(N * C, HW_out)
        acc = jnp.dot(wc2_ref[...], xoff, preferred_element_type=f32)  # (outc, HW_out)

        # folded BatchNorm (inference) + SiLU, lane-dense store
        y = acc * bns_ref[...] + bnt_ref[...]
        o_ref[...] = (y * jax.nn.sigmoid(y)).astype(o_ref.dtype)

    return kernel


@functools.partial(jax.jit, static_argnames=("num_param", "stride", "eps"))
def akconv_forward(x, wp, bp, wc, bn_gamma, bn_beta, bn_mean, bn_var,
                   *, num_param, stride=1, eps=1e-5):
    """AKConv forward. x:(B,C,H,W), wp:(2N,C,3,3), bp:(2N,), wc:(outc,C,N,1)."""
    B, C, H, W = x.shape
    N = num_param
    outc = wc.shape[0]
    f32 = jnp.float32

    # p_conv: a standard 3x3 conv, evaluated by XLA in the wrapper (perf-review
    # option (a)).  Only the small (2N, HW_out) offset map enters the kernel.
    offset = jax.lax.conv_general_dilated(
        x.astype(f32), wp.astype(f32),
        window_strides=(stride, stride), padding=((1, 1), (1, 1)),
        dimension_numbers=("NCHW", "OIHW", "NCHW"),
        precision=jax.lax.Precision.HIGHEST) + bp.astype(f32)[None, :, None, None]
    h_out, w_out = offset.shape[2], offset.shape[3]
    HW_out = h_out * w_out
    offset = offset.reshape(B, 2 * N, HW_out)

    # constant base positions p_0 + p_n (AKConv._get_p_0 / _get_p_n), lane-dense
    pn_x, pn_y = _get_p_n(N)
    p0_x = np.broadcast_to((np.arange(h_out) * stride).astype(np.float32)[:, None],
                           (h_out, w_out)).reshape(-1)
    p0_y = np.broadcast_to((np.arange(w_out) * stride).astype(np.float32)[None, :],
                           (h_out, w_out)).reshape(-1)
    p_base_x = jnp.asarray(p0_x[None, :] + pn_x[:, None], f32)   # (N, HW_out)
    p_base_y = jnp.asarray(p0_y[None, :] + pn_y[:, None], f32)

    # main conv weight (outc, C, N, 1) -> (outc, N*C) with K ordered n*C + c,
    # matching the kernel's stacked x_offset scratch
    wc2 = jnp.transpose(wc[:, :, :, 0], (0, 2, 1)).reshape(outc, N * C).astype(f32)

    # fold BatchNorm2d (inference mode) into per-channel scale/shift
    inv = 1.0 / jnp.sqrt(bn_var.astype(f32) + eps)
    bn_scale = (bn_gamma.astype(f32) * inv).reshape(outc, 1)
    bn_shift = (bn_beta.astype(f32)
                - bn_mean.astype(f32) * bn_gamma.astype(f32) * inv).reshape(outc, 1)

    kernel = _make_kernel(C, N, outc, H, W, HW_out)

    # advisory cost estimate (helps XLA schedule around the custom call)
    flops = B * (N * 2 * C * H * W * HW_out        # separable gather matmuls
                 + 2 * outc * N * C * HW_out       # stacked main conv
                 + 48 * N * HW_out)                # gate / position elementwise
    bytes_accessed = 4 * (x.size + offset.size + B * outc * HW_out
                          + 2 * N * HW_out + outc * N * C + 2 * outc)
    cost = pl.CostEstimate(flops=flops,
                           transcendentals=B * outc * HW_out,
                           bytes_accessed=bytes_accessed)

    out = pl.pallas_call(
        kernel,
        out_shape=jax.ShapeDtypeStruct((B, outc, HW_out), f32),
        grid_spec=pltpu.PrefetchScalarGridSpec(
            num_scalar_prefetch=0,
            grid=(B,),
            in_specs=[
                pl.BlockSpec((None, C, H, W), lambda b: (b, 0, 0, 0)),      # x
                pl.BlockSpec((None, 2 * N, HW_out), lambda b: (b, 0, 0)),   # offsets
                pl.BlockSpec((N, HW_out), lambda b: (0, 0)),                # p_base_x
                pl.BlockSpec((N, HW_out), lambda b: (0, 0)),                # p_base_y
                pl.BlockSpec((outc, N * C), lambda b: (0, 0)),              # wc2
                pl.BlockSpec((outc, 1), lambda b: (0, 0)),                  # bn_scale
                pl.BlockSpec((outc, 1), lambda b: (0, 0)),                  # bn_shift
            ],
            out_specs=pl.BlockSpec((None, outc, HW_out), lambda b: (b, 0, 0)),
            scratch_shapes=[pltpu.VMEM((N, C, HW_out), jnp.float32)],
        ),
        compiler_params=pltpu.CompilerParams(
            dimension_semantics=("parallel",),   # independent batch elements
        ),
        cost_estimate=cost,
    )(x.astype(f32), offset, p_base_x, p_base_y, wc2, bn_scale, bn_shift)

    return out.reshape(B, outc, h_out, w_out)


def akconv_ref(x, wp, bp, wc, bn_gamma, bn_beta, bn_mean, bn_var,
               *, num_param, stride=1, eps=1e-5):
    """Pure-JAX reference mirroring the PyTorch AKConv.forward (BN in eval mode)."""
    B, C, H, W = x.shape
    N = num_param
    offset = jax.lax.conv_general_dilated(
        x, wp, window_strides=(stride, stride), padding=((1, 1), (1, 1)),
        dimension_numbers=("NCHW", "OIHW", "NCHW"),
        precision=jax.lax.Precision.HIGHEST) + bp[None, :, None, None]
    h_out, w_out = offset.shape[2], offset.shape[3]

    pn_x, pn_y = _get_p_n(N)
    p0_x = np.broadcast_to((np.arange(h_out) * stride).astype(np.float32)[:, None],
                           (h_out, w_out))
    p0_y = np.broadcast_to((np.arange(w_out) * stride).astype(np.float32)[None, :],
                           (h_out, w_out))

    p_x = p0_x[None, :, :, None] + pn_x[None, None, None, :] \
        + jnp.transpose(offset[:, :N], (0, 2, 3, 1))
    p_y = p0_y[None, :, :, None] + pn_y[None, None, None, :] \
        + jnp.transpose(offset[:, N:], (0, 2, 3, 1))

    fl_x, fl_y = jnp.floor(p_x), jnp.floor(p_y)
    q_lt_x = jnp.clip(fl_x, 0, H - 1)
    q_lt_y = jnp.clip(fl_y, 0, W - 1)
    q_rb_x = jnp.clip(fl_x + 1, 0, H - 1)
    q_rb_y = jnp.clip(fl_y + 1, 0, W - 1)
    pcx = jnp.clip(p_x, 0, H - 1)
    pcy = jnp.clip(p_y, 0, W - 1)

    g_lt = (1 + (q_lt_x - pcx)) * (1 + (q_lt_y - pcy))
    g_rb = (1 - (q_rb_x - pcx)) * (1 - (q_rb_y - pcy))
    g_lb = (1 + (q_lt_x - pcx)) * (1 - (q_rb_y - pcy))
    g_rt = (1 - (q_rb_x - pcx)) * (1 + (q_lt_y - pcy))

    x_flat = x.reshape(B, C, H * W)

    def gather(qx, qy):
        idx = (qx * W + qy).astype(jnp.int32).reshape(B, 1, h_out * w_out * N)
        idx = jnp.broadcast_to(idx, (B, C, h_out * w_out * N))
        return jnp.take_along_axis(x_flat, idx, axis=2).reshape(B, C, h_out, w_out, N)

    x_off = (g_lt[:, None] * gather(q_lt_x, q_lt_y)
             + g_rb[:, None] * gather(q_rb_x, q_rb_y)
             + g_lb[:, None] * gather(q_lt_x, q_rb_y)
             + g_rt[:, None] * gather(q_rb_x, q_lt_y))          # (B,C,h,w,N)

    # rearrange 'b c h w n -> b c (h n) w'
    x_off = jnp.transpose(x_off, (0, 1, 2, 4, 3)).reshape(B, C, h_out * N, w_out)
    out = jax.lax.conv_general_dilated(
        x_off, wc, window_strides=(N, 1), padding=((0, 0), (0, 0)),
        dimension_numbers=("NCHW", "OIHW", "NCHW"),
        precision=jax.lax.Precision.HIGHEST)
    out = (out - bn_mean[None, :, None, None]) \
        / jnp.sqrt(bn_var + eps)[None, :, None, None] \
        * bn_gamma[None, :, None, None] + bn_beta[None, :, None, None]
    return out * jax.nn.sigmoid(out)


if __name__ == "__main__":
    B, C, H, W = 2, 4, 16, 16
    outc, num_param, stride = 8, 5, 1
    N = num_param

    key = jax.random.PRNGKey(0)
    k = jax.random.split(key, 7)

    x = jax.random.normal(k[0], (B, C, H, W), dtype=jnp.float32)

    # p_conv: weight zero-initialised exactly as in AKConv.__init__
    # (nn.init.constant_(self.p_conv.weight, 0)); the random bias drives the
    # offsets.  Non-zero weights are fully supported (the same lax.conv path
    # runs regardless); zero weights keep floor() boundary decisions bitwise
    # identical between the forward and the reference.
    wp = jnp.zeros((2 * N, C, 3, 3), dtype=jnp.float32)
    bp = jax.random.uniform(k[1], (2 * N,), dtype=jnp.float32, minval=-1.5, maxval=1.5)

    # main conv (num_param,1)/(num_param,1), bias=None in the module
    wc = jax.random.normal(k[2], (outc, C, N, 1), dtype=jnp.float32) / math.sqrt(C * N)

    # BatchNorm2d(outc) parameters / running stats (inference mode)
    bn_gamma = 1.0 + 0.1 * jax.random.normal(k[3], (outc,), dtype=jnp.float32)
    bn_beta = 0.1 * jax.random.normal(k[4], (outc,), dtype=jnp.float32)
    bn_mean = 0.1 * jax.random.normal(k[5], (outc,), dtype=jnp.float32)
    bn_var = 1.0 + 0.5 * jax.random.uniform(k[6], (outc,), dtype=jnp.float32)

    out = akconv_forward(x, wp, bp, wc, bn_gamma, bn_beta, bn_mean, bn_var,
                         num_param=num_param, stride=stride)
    out = jax.block_until_ready(out)

    ref = akconv_ref(x, wp, bp, wc, bn_gamma, bn_beta, bn_mean, bn_var,
                     num_param=num_param, stride=stride)

    assert out.shape == ref.shape == (B, outc, H, W)
    err = float(jnp.max(jnp.abs(out - ref)))
    assert jnp.allclose(out, ref, atol=5e-4, rtol=5e-4), \
        f"mismatch vs reference (max abs err {err})"

    print("KERNEL_OK")
</pallas_src>

<mosaic_0001>
module attributes {stable_mosaic.version = 11 : i64} {
  func.func @kernel(%arg0: i32, %arg1: memref<1x4x16x16xf32, #tpu.memory_space<vmem>>, %arg2: memref<1x10x256xf32, #tpu.memory_space<vmem>>, %arg3: memref<5x256xf32, #tpu.memory_space<vmem>>, %arg4: memref<5x256xf32, #tpu.memory_space<vmem>>, %arg5: memref<8x20xf32, #tpu.memory_space<vmem>>, %arg6: memref<8x1xf32, #tpu.memory_space<vmem>>, %arg7: memref<8x1xf32, #tpu.memory_space<vmem>>, %arg8: memref<1x8x256xf32, #tpu.memory_space<vmem>>, %arg9: memref<5x4x256xf32, #tpu.memory_space<vmem>>) attributes {dimension_semantics = [#tpu.dimension_semantics<parallel>], iteration_bounds = array<i64: 2>, scalar_prefetch = 0 : i64, scratch_operands = 1 : i64, tpu.core_type = #tpu.core_type<tc>, window_params = [{transform_indices = @transform_0, window_bounds = array<i64: 1, 4, 16, 16>}, {transform_indices = @transform_1, window_bounds = array<i64: 1, 10, 256>}, {pipeline_mode = #tpu.pipeline_mode<synchronous>, transform_indices = @transform_2, window_bounds = array<i64: 5, 256>}, {pipeline_mode = #tpu.pipeline_mode<synchronous>, transform_indices = @transform_3, window_bounds = array<i64: 5, 256>}, {pipeline_mode = #tpu.pipeline_mode<synchronous>, transform_indices = @transform_4, window_bounds = array<i64: 8, 20>}, {pipeline_mode = #tpu.pipeline_mode<synchronous>, transform_indices = @transform_5, window_bounds = array<i64: 8, 1>}, {pipeline_mode = #tpu.pipeline_mode<synchronous>, transform_indices = @transform_6, window_bounds = array<i64: 8, 1>}, {transform_indices = @transform_7, window_bounds = array<i64: 1, 8, 256>}]} {
    %c0 = arith.constant 0 : index
    %c0_0 = arith.constant 0 : index
    %c0_1 = arith.constant 0 : index
    %c0_2 = arith.constant 0 : index
    %0 = vector.load %arg1[%c0, %c0_0, %c0_1, %c0_2] : memref<1x4x16x16xf32, #tpu.memory_space<vmem>>, vector<1x4x16x16xf32>
    %1 = vector.shape_cast %0 : vector<1x4x16x16xf32> to vector<4x16x16xf32>
    %2 = vector.shape_cast %1 : vector<4x16x16xf32> to vector<64x16xf32>
    %3 = tpu.iota {dimensions = array<i32: 0>} : vector<16x256xi32>
    %4 = tpu.iota {dimensions = array<i32: 0>} : vector<16x256xi32>
    %c0_i32 = arith.constant 0 : i32
    %5 = arith.index_cast %c0_i32 : i32 to index
    %c0_3 = arith.constant 0 : index
    %6 = vector.load %arg3[%5, %c0_3] : memref<5x256xf32, #tpu.memory_space<vmem>>, vector<1x256xf32>
    %c0_4 = arith.constant 0 : index
    %7 = arith.index_cast %c0_i32 : i32 to index
    %c0_5 = arith.constant 0 : index
    %8 = vector.load %arg2[%c0_4, %7, %c0_5] : memref<1x10x256xf32, #tpu.memory_space<vmem>>, vector<1x1x256xf32>
    %9 = vector.shape_cast %8 : vector<1x1x256xf32> to vector<1x256xf32>
    %10 = arith.addf %6, %9 : vector<1x256xf32>
    %11 = arith.index_cast %c0_i32 : i32 to index
    %c0_6 = arith.constant 0 : index
    %12 = vector.load %arg4[%11, %c0_6] : memref<5x256xf32, #tpu.memory_space<vmem>>, vector<1x256xf32>
    %c5_i32 = arith.constant 5 : i32
    %13 = arith.addi %c5_i32, %c0_i32 : i32
    %c0_7 = arith.constant 0 : index
    %14 = arith.index_cast %13 : i32 to index
    %c0_8 = arith.constant 0 : index
    %15 = vector.load %arg2[%c0_7, %14, %c0_8] : memref<1x10x256xf32, #tpu.memory_space<vmem>>, vector<1x1x256xf32>
    %16 = vector.shape_cast %15 : vector<1x1x256xf32> to vector<1x256xf32>
    %17 = arith.addf %12, %16 : vector<1x256xf32>
    %18 = math.floor %10 : vector<1x256xf32>
    %19 = math.floor %17 : vector<1x256xf32>
    %cst = arith.constant 0.000000e+00 : f32
    %cst_9 = arith.constant 1.500000e+01 : f32
    %20 = vector.broadcast %cst : f32 to vector<1x256xf32>
    %21 = arith.maximumf %20, %18 : vector<1x256xf32>
    %22 = vector.broadcast %cst_9 : f32 to vector<1x256xf32>
    %23 = arith.minimumf %22, %21 : vector<1x256xf32>
    %cst_10 = arith.constant 1.000000e+00 : f32
    %24 = vector.broadcast %cst_10 : f32 to vector<1x256xf32>
    %25 = arith.addf %18, %24 : vector<1x256xf32>
    %cst_11 = arith.constant 0.000000e+00 : f32
    %cst_12 = arith.constant 1.500000e+01 : f32
    %26 = vector.broadcast %cst_11 : f32 to vector<1x256xf32>
    %27 = arith.maximumf %26, %25 : vector<1x256xf32>
    %28 = vector.broadcast %cst_12 : f32 to vector<1x256xf32>
    %29 = arith.minimumf %28, %27 : vector<1x256xf32>
    %cst_13 = arith.constant 0.000000e+00 : f32
    %cst_14 = arith.constant 1.500000e+01 : f32
    %30 = vector.broadcast %cst_13 : f32 to vector<1x256xf32>
    %31 = arith.maximumf %30, %19 : vector<1x256xf32>
    %32 = vector.broadcast %cst_14 : f32 to vector<1x256xf32>
    %33 = arith.minimumf %32, %31 : vector<1x256xf32>
    %cst_15 = arith.constant 1.000000e+00 : f32
    %34 = vector.broadcast %cst_15 : f32 to vector<1x256xf32>
    %35 = arith.addf %19, %34 : vector<1x256xf32>
    %cst_16 = arith.constant 0.000000e+00 : f32
    %cst_17 = arith.constant 1.500000e+01 : f32
    %36 = vector.broadcast %cst_16 : f32 to vector<1x256xf32>
    %37 = arith.maximumf %36, %35 : vector<1x256xf32>
    %38 = vector.broadcast %cst_17 : f32 to vector<1x256xf32>
    %39 = arith.minimumf %38, %37 : vector<1x256xf32>
    %cst_18 = arith.constant 0.000000e+00 : f32
    %cst_19 = arith.constant 1.500000e+01 : f32
    %40 = vector.broadcast %cst_18 : f32 to vector<1x256xf32>
    %41 = arith.maximumf %40, %10 : vector<1x256xf32>
    %42 = vector.broadcast %cst_19 : f32 to vector<1x256xf32>
    %43 = arith.minimumf %42, %41 : vector<1x256xf32>
    %cst_20 = arith.constant 0.000000e+00 : f32
    %cst_21 = arith.constant 1.500000e+01 : f32
    %44 = vector.broadcast %cst_20 : f32 to vector<1x256xf32>
    %45 = arith.maximumf %44, %17 : vector<1x256xf32>
    %46 = vector.broadcast %cst_21 : f32 to vector<1x256xf32>
    %47 = arith.minimumf %46, %45 : vector<1x256xf32>
    %48 = arith.subf %23, %43 : vector<1x256xf32>
    %cst_22 = arith.constant 1.000000e+00 : f32
    %49 = vector.broadcast %cst_22 : f32 to vector<1x256xf32>
    %50 = arith.addf %49, %48 : vector<1x256xf32>
    %51 = arith.subf %29, %43 : vector<1x256xf32>
    %cst_23 = arith.constant 1.000000e+00 : f32
    %52 = vector.broadcast %cst_23 : f32 to vector<1x256xf32>
    %53 = arith.subf %52, %51 : vector<1x256xf32>
    %54 = arith.subf %33, %47 : vector<1x256xf32>
    %cst_24 = arith.constant 1.000000e+00 : f32
    %55 = vector.broadcast %cst_24 : f32 to vector<1x256xf32>
    %56 = arith.addf %55, %54 : vector<1x256xf32>
    %57 = arith.subf %39, %47 : vector<1x256xf32>
    %cst_25 = arith.constant 1.000000e+00 : f32
    %58 = vector.broadcast %cst_25 : f32 to vector<1x256xf32>
    %59 = arith.subf %58, %57 : vector<1x256xf32>
    %60 = arith.fptosi %23 : vector<1x256xf32> to vector<1x256xi32>
    %61 = arith.fptosi %29 : vector<1x256xf32> to vector<1x256xi32>
    %62 = arith.fptosi %33 : vector<1x256xf32> to vector<1x256xi32>
    %63 = arith.fptosi %39 : vector<1x256xf32> to vector<1x256xi32>
    %64 = vector.broadcast %60 : vector<1x256xi32> to vector<16x256xi32>
    %65 = arith.cmpi eq, %3, %64 : vector<16x256xi32>
    %cst_26 = arith.constant 0.000000e+00 : f32
    %66 = vector.shape_cast %50 : vector<1x256xf32> to vector<1x256xf32>
    %67 = vector.broadcast %66 : vector<1x256xf32> to vector<16x256xf32>
    %68 = vector.broadcast %cst_26 : f32 to vector<16x256xf32>
    %69 = arith.select %65, %67, %68 : vector<16x256xi1>, vector<16x256xf32>
    %70 = vector.broadcast %61 : vector<1x256xi32> to vector<16x256xi32>
    %71 = arith.cmpi eq, %3, %70 : vector<16x256xi32>
    %cst_27 = arith.constant 0.000000e+00 : f32
    %72 = vector.shape_cast %53 : vector<1x256xf32> to vector<1x256xf32>
    %73 = vector.broadcast %72 : vector<1x256xf32> to vector<16x256xf32>
    %74 = vector.broadcast %cst_27 : f32 to vector<16x256xf32>
    %75 = arith.select %71, %73, %74 : vector<16x256xi1>, vector<16x256xf32>
    %76 = arith.addf %69, %75 : vector<16x256xf32>
    %77 = vector.broadcast %62 : vector<1x256xi32> to vector<16x256xi32>
    %78 = arith.cmpi eq, %4, %77 : vector<16x256xi32>
    %cst_28 = arith.constant 0.000000e+00 : f32
    %79 = vector.shape_cast %56 : vector<1x256xf32> to vector<1x256xf32>
    %80 = vector.broadcast %79 : vector<1x256xf32> to vector<16x256xf32>
    %81 = vector.broadcast %cst_28 : f32 to vector<16x256xf32>
    %82 = arith.select %78, %80, %81 : vector<16x256xi1>, vector<16x256xf32>
    %83 = vector.broadcast %63 : vector<1x256xi32> to vector<16x256xi32>
    %84 = arith.cmpi eq, %4, %83 : vector<16x256xi32>
    %cst_29 = arith.constant 0.000000e+00 : f32
    %85 = vector.shape_cast %59 : vector<1x256xf32> to vector<1x256xf32>
    %86 = vector.broadcast %85 : vector<1x256xf32> to vector<16x256xf32>
    %87 = vector.broadcast %cst_29 : f32 to vector<16x256xf32>
    %88 = arith.select %84, %86, %87 : vector<16x256xi1>, vector<16x256xf32>
    %89 = arith.addf %82, %88 : vector<16x256xf32>
    %cst_30 = arith.constant dense<0.000000e+00> : vector<64x256xf32>
    %90 = tpu.matmul %2, %89, %cst_30 {dimension_numbers = #tpu.dot_dimension_numbers<[1], [0], [0], [1], [0, 0, 1, 1], [], []>} : vector<64x16xf32>, vector<16x256xf32>, vector<64x256xf32> -> vector<64x256xf32>
    %91 = vector.shape_cast %90 : vector<64x256xf32> to vector<4x16x256xf32>
    %92 = vector.shape_cast %76 : vector<16x256xf32> to vector<1x16x256xf32>
    %93 = vector.broadcast %92 : vector<1x16x256xf32> to vector<4x16x256xf32>
    %94 = arith.mulf %91, %93 : vector<4x16x256xf32>
    %cst_31 = arith.constant dense<0.000000e+00> : vector<4x256xf32>
    %95 = vector.multi_reduction <add>, %94, %cst_31 [1] : vector<4x16x256xf32> to vector<4x256xf32>
    %96 = arith.index_cast %c0_i32 : i32 to index
    %c0_32 = arith.constant 0 : index
    %c0_33 = arith.constant 0 : index
    %97 = vector.load %arg9[%96, %c0_32, %c0_33] : memref<5x4x256xf32, #tpu.memory_space<vmem>>, vector<1x4x256xf32>
    %98 = vector.shape_cast %97 : vector<1x4x256xf32> to vector<4x256xf32>
    %99 = vector.shape_cast %95 : vector<4x256xf32> to vector<1x4x256xf32>
    tpu.vector_store %arg9[%96, %c0_32, %c0_33], %99 {strides = array<i32>} : memref<5x4x256xf32, #tpu.memory_space<vmem>>, vector<1x4x256xf32>,
    %c1_i32 = arith.constant 1 : i32
    %100 = arith.index_cast %c1_i32 : i32 to index
    %c0_34 = arith.constant 0 : index
    %101 = vector.load %arg3[%100, %c0_34] : memref<5x256xf32, #tpu.memory_space<vmem>>, vector<1x256xf32>
    %c0_35 = arith.constant 0 : index
    %102 = arith.index_cast %c1_i32 : i32 to index
    %c0_36 = arith.constant 0 : index
    %103 = vector.load %arg2[%c0_35, %102, %c0_36] : memref<1x10x256xf32, #tpu.memory_space<vmem>>, vector<1x1x256xf32>
    %104 = vector.shape_cast %103 : vector<1x1x256xf32> to vector<1x256xf32>
    %105 = arith.addf %101, %104 : vector<1x256xf32>
    %106 = arith.index_cast %c1_i32 : i32 to index
    %c0_37 = arith.constant 0 : index
    %107 = vector.load %arg4[%106, %c0_37] : memref<5x256xf32, #tpu.memory_space<vmem>>, vector<1x256xf32>
    %c5_i32_38 = arith.constant 5 : i32
    %108 = arith.addi %c5_i32_38, %c1_i32 : i32
    %c0_39 = arith.constant 0 : index
    %109 = arith.index_cast %108 : i32 to index
    %c0_40 = arith.constant 0 : index
    %110 = vector.load %arg2[%c0_39, %109, %c0_40] : memref<1x10x256xf32, #tpu.memory_space<vmem>>, vector<1x1x256xf32>
    %111 = vector.shape_cast %110 : vector<1x1x256xf32> to vector<1x256xf32>
    %112 = arith.addf %107, %111 : vector<1x256xf32>
    %113 = math.floor %105 : vector<1x256xf32>
    %114 = math.floor %112 : vector<1x256xf32>
    %cst_41 = arith.constant 0.000000e+00 : f32
    %cst_42 = arith.constant 1.500000e+01 : f32
    %115 = vector.broadcast %cst_41 : f32 to vector<1x256xf32>
    %116 = arith.maximumf %115, %113 : vector<1x256xf32>
    %117 = vector.broadcast %cst_42 : f32 to vector<1x256xf32>
    %118 = arith.minimumf %117, %116 : vector<1x256xf32>
    %cst_43 = arith.constant 1.000000e+00 : f32
    %119 = vector.broadcast %cst_43 : f32 to vector<1x256xf32>
    %120 = arith.addf %113, %119 : vector<1x256xf32>
    %cst_44 = arith.constant 0.000000e+00 : f32
    %cst_45 = arith.constant 1.500000e+01 : f32
    %121 = vector.broadcast %cst_44 : f32 to vector<1x256xf32>
    %122 = arith.maximumf %121, %120 : vector<1x256xf32>
    %123 = vector.broadcast %cst_45 : f32 to vector<1x256xf32>
    %124 = arith.minimumf %123, %122 : vector<1x256xf32>
    %cst_46 = arith.constant 0.000000e+00 : f32
    %cst_47 = arith.constant 1.500000e+01 : f32
    %125 = vector.broadcast %cst_46 : f32 to vector<1x256xf32>
    %126 = arith.maximumf %125, %114 : vector<1x256xf32>
    %127 = vector.broadcast %cst_47 : f32 to vector<1x256xf32>
    %128 = arith.minimumf %127, %126 : vector<1x256xf32>
    %cst_48 = arith.constant 1.000000e+00 : f32
    %129 = vector.broadcast %cst_48 : f32 to vector<1x256xf32>
    %130 = arith.addf %114, %129 : vector<1x256xf32>
    %cst_49 = arith.constant 0.000000e+00 : f32
    %cst_50 = arith.constant 1.500000e+01 : f32
    %131 = vector.broadcast %cst_49 : f32 to vector<1x256xf32>
    %132 = arith.maximumf %131, %130 : vector<1x256xf32>
    %133 = vector.broadcast %cst_50 : f32 to vector<1x256xf32>
    %134 = arith.minimumf %133, %132 : vector<1x256xf32>
    %cst_51 = arith.constant 0.000000e+00 : f32
    %cst_52 = arith.constant 1.500000e+01 : f32
    %135 = vector.broadcast %cst_51 : f32 to vector<1x256xf32>
    %136 = arith.maximumf %135, %105 : vector<1x256xf32>
    %137 = vector.broadcast %cst_52 : f32 to vector<1x256xf32>
    %138 = arith.minimumf %137, %136 : vector<1x256xf32>
    %cst_53 = arith.constant 0.000000e+00 : f32
    %cst_54 = arith.constant 1.500000e+01 : f32
    %139 = vector.broadcast %cst_53 : f32 to vector<1x256xf32>
    %140 = arith.maximumf %139, %112 : vector<1x256xf32>
    %141 = vector.broadcast %cst_54 : f32 to vector<1x256xf32>
    %142 = arith.minimumf %141, %140 : vector<1x256xf32>
    %143 = arith.subf %118, %138 : vector<1x256xf32>
    %cst_55 = arith.constant 1.000000e+00 : f32
    %144 = vector.broadcast %cst_55 : f32 to vector<1x256xf32>
    %145 = arith.addf %144, %143 : vector<1x256xf32>
    %146 = arith.subf %124, %138 : vector<1x256xf32>
    %cst_56 = arith.constant 1.000000e+00 : f32
    %147 = vector.broadcast %cst_56 : f32 to vector<1x256xf32>
    %148 = arith.subf %147, %146 : vector<1x256xf32>
    %149 = arith.subf %128, %142 : vector<1x256xf32>
    %cst_57 = arith.constant 1.000000e+00 : f32
    %150 = vector.broadcast %cst_57 : f32 to vector<1x256xf32>
    %151 = arith.addf %150, %149 : vector<1x256xf32>
    %152 = arith.subf %134, %142 : vector<1x256xf32>
    %cst_58 = arith.constant 1.000000e+00 : f32
    %153 = vector.broadcast %cst_58 : f32 to vector<1x256xf32>
    %154 = arith.subf %153, %152 : vector<1x256xf32>
    %155 = arith.fptosi %118 : vector<1x256xf32> to vector<1x256xi32>
    %156 = arith.fptosi %124 : vector<1x256xf32> to vector<1x256xi32>
    %157 = arith.fptosi %128 : vector<1x256xf32> to vector<1x256xi32>
    %158 = arith.fptosi %134 : vector<1x256xf32> to vector<1x256xi32>
    %159 = vector.broadcast %155 : vector<1x256xi32> to vector<16x256xi32>
    %160 = arith.cmpi eq, %3, %159 : vector<16x256xi32>
    %cst_59 = arith.constant 0.000000e+00 : f32
    %161 = vector.shape_cast %145 : vector<1x256xf32> to vector<1x256xf32>
    %162 = vector.broadcast %161 : vector<1x256xf32> to vector<16x256xf32>
    %163 = vector.broadcast %cst_59 : f32 to vector<16x256xf32>
    %164 = arith.select %160, %162, %163 : vector<16x256xi1>, vector<16x256xf32>
    %165 = vector.broadcast %156 : vector<1x256xi32> to vector<16x256xi32>
    %166 = arith.cmpi eq, %3, %165 : vector<16x256xi32>
    %cst_60 = arith.constant 0.000000e+00 : f32
    %167 = vector.shape_cast %148 : vector<1x256xf32> to vector<1x256xf32>
    %168 = vector.broadcast %167 : vector<1x256xf32> to vector<16x256xf32>
    %169 = vector.broadcast %cst_60 : f32 to vector<16x256xf32>
    %170 = arith.select %166, %168, %169 : vector<16x256xi1>, vector<16x256xf32>
    %171 = arith.addf %164, %170 : vector<16x256xf32>
    %172 = vector.broadcast %157 : vector<1x256xi32> to vector<16x256xi32>
    %173 = arith.cmpi eq, %4, %172 : vector<16x256xi32>
    %cst_61 = arith.constant 0.000000e+00 : f32
    %174 = vector.shape_cast %151 : vector<1x256xf32> to vector<1x256xf32>
    %175 = vector.broadcast %174 : vector<1x256xf32> to vector<16x256xf32>
    %176 = vector.broadcast %cst_61 : f32 to vector<16x256xf32>
    %177 = arith.select %173, %175, %176 : vector<16x256xi1>, vector<16x256xf32>
    %178 = vector.broadcast %158 : vector<1x256xi32> to vector<16x256xi32>
    %179 = arith.cmpi eq, %4, %178 : vector<16x256xi32>
    %cst_62 = arith.constant 0.000000e+00 : f32
    %180 = vector.shape_cast %154 : vector<1x256xf32> to vector<1x256xf32>
    %181 = vector.broadcast %180 : vector<1x256xf32> to vector<16x256xf32>
    %182 = vector.broadcast %cst_62 : f32 to vector<16x256xf32>
    %183 = arith.select %179, %181, %182 : vector<16x256xi1>, vector<16x256xf32>
    %184 = arith.addf %177, %183 : vector<16x256xf32>
    %cst_63 = arith.constant dense<0.000000e+00> : vector<64x256xf32>
    %185 = tpu.matmul %2, %184, %cst_63 {dimension_numbers = #tpu.dot_dimension_numbers<[1], [0], [0], [1], [0, 0, 1, 1], [], []>} : vector<64x16xf32>, vector<16x256xf32>, vector<64x256xf32> -> vector<64x256xf32>
    %186 = vector.shape_cast %185 : vector<64x256xf32> to vector<4x16x256xf32>
    %187 = vector.shape_cast %171 : vector<16x256xf32> to vector<1x16x256xf32>
    %188 = vector.broadcast %187 : vector<1x16x256xf32> to vector<4x16x256xf32>
    %189 = arith.mulf %186, %188 : vector<4x16x256xf32>
    %cst_64 = arith.constant dense<0.000000e+00> : vector<4x256xf32>
    %190 = vector.multi_reduction <add>, %189, %cst_64 [1] : vector<4x16x256xf32> to vector<4x256xf32>
    %191 = arith.index_cast %c1_i32 : i32 to index
    %c0_65 = arith.constant 0 : index
    %c0_66 = arith.constant 0 : index
    %192 = vector.load %arg9[%191, %c0_65, %c0_66] : memref<5x4x256xf32, #tpu.memory_space<vmem>>, vector<1x4x256xf32>
    %193 = vector.shape_cast %192 : vector<1x4x256xf32> to vector<4x256xf32>
    %194 = vector.shape_cast %190 : vector<4x256xf32> to vector<1x4x256xf32>
    tpu.vector_store %arg9[%191, %c0_65, %c0_66], %194 {strides = array<i32>} : memref<5x4x256xf32, #tpu.memory_space<vmem>>, vector<1x4x256xf32>,
    %c2_i32 = arith.constant 2 : i32
    %195 = arith.index_cast %c2_i32 : i32 to index
    %c0_67 = arith.constant 0 : index
    %196 = vector.load %arg3[%195, %c0_67] : memref<5x256xf32, #tpu.memory_space<vmem>>, vector<1x256xf32>
    %c0_68 = arith.constant 0 : index
    %197 = arith.index_cast %c2_i32 : i32 to index
    %c0_69 = arith.constant 0 : index
    %198 = vector.load %arg2[%c0_68, %197, %c0_69] : memref<1x10x256xf32, #tpu.memory_space<vmem>>, vector<1x1x256xf32>
    %199 = vector.shape_cast %198 : vector<1x1x256xf32> to vector<1x256xf32>
    %200 = arith.addf %196, %199 : vector<1x256xf32>
    %201 = arith.index_cast %c2_i32 : i32 to index
    %c0_70 = arith.constant 0 : index
    %202 = vector.load %arg4[%201, %c0_70] : memref<5x256xf32, #tpu.memory_space<vmem>>, vector<1x256xf32>
    %c5_i32_71 = arith.constant 5 : i32
    %203 = arith.addi %c5_i32_71, %c2_i32 : i32
    %c0_72 = arith.constant 0 : index
    %204 = arith.index_cast %203 : i32 to index
    %c0_73 = arith.constant 0 : index
    %205 = vector.load %arg2[%c0_72, %204, %c0_73] : memref<1x10x256xf32, #tpu.memory_space<vmem>>, vector<1x1x256xf32>
    %206 = vector.shape_cast %205 : vector<1x1x256xf32> to vector<1x256xf32>
    %207 = arith.addf %202, %206 : vector<1x256xf32>
    %208 = math.floor %200 : vector<1x256xf32>
    %209 = math.floor %207 : vector<1x256xf32>
    %cst_74 = arith.constant 0.000000e+00 : f32
    %cst_75 = arith.constant 1.500000e+01 : f32
    %210 = vector.broadcast %cst_74 : f32 to vector<1x256xf32>
    %211 = arith.maximumf %210, %208 : vector<1x256xf32>
    %212 = vector.broadcast %cst_75 : f32 to vector<1x256xf32>
    %213 = arith.minimumf %212, %211 : vector<1x256xf32>
    %cst_76 = arith.constant 1.000000e+00 : f32
    %214 = vector.broadcast %cst_76 : f32 to vector<1x256xf32>
    %215 = arith.addf %208, %214 : vector<1x256xf32>
    %cst_77 = arith.constant 0.000000e+00 : f32
    %cst_78 = arith.constant 1.500000e+01 : f32
    %216 = vector.broadcast %cst_77 : f32 to vector<1x256xf32>
    %217 = arith.maximumf %216, %215 : vector<1x256xf32>
    %218 = vector.broadcast %cst_78 : f32 to vector<1x256xf32>
    %219 = arith.minimumf %218, %217 : vector<1x256xf32>
    %cst_79 = arith.constant 0.000000e+00 : f32
    %cst_80 = arith.constant 1.500000e+01 : f32
    %220 = vector.broadcast %cst_79 : f32 to vector<1x256xf32>
    %221 = arith.maximumf %220, %209 : vector<1x256xf32>
    %222 = vector.broadcast %cst_80 : f32 to vector<1x256xf32>
    %223 = arith.minimumf %222, %221 : vector<1x256xf32>
    %cst_81 = arith.constant 1.000000e+00 : f32
    %224 = vector.broadcast %cst_81 : f32 to vector<1x256xf32>
    %225 = arith.addf %209, %224 : vector<1x256xf32>
    %cst_82 = arith.constant 0.000000e+00 : f32
    %cst_83 = arith.constant 1.500000e+01 : f32
    %226 = vector.broadcast %cst_82 : f32 to vector<1x256xf32>
    %227 = arith.maximumf %226, %225 : vector<1x256xf32>
    %228 = vector.broadcast %cst_83 : f32 to vector<1x256xf32>
    %229 = arith.minimumf %228, %227 : vector<1x256xf32>
    %cst_84 = arith.constant 0.000000e+00 : f32
    %cst_85 = arith.constant 1.500000e+01 : f32
    %230 = vector.broadcast %cst_84 : f32 to vector<1x256xf32>
    %231 = arith.maximumf %230, %200 : vector<1x256xf32>
    %232 = vector.broadcast %cst_85 : f32 to vector<1x256xf32>
    %233 = arith.minimumf %232, %231 : vector<1x256xf32>
    %cst_86 = arith.constant 0.000000e+00 : f32
    %cst_87 = arith.constant 1.500000e+01 : f32
    %234 = vector.broadcast %cst_86 : f32 to vector<1x256xf32>
    %235 = arith.maximumf %234, %207 : vector<1x256xf32>
    %236 = vector.broadcast %cst_87 : f32 to vector<1x256xf32>
    %237 = arith.minimumf %236, %235 : vector<1x256xf32>
    %238 = arith.subf %213, %233 : vector<1x256xf32>
    %cst_88 = arith.constant 1.000000e+00 : f32
    %239 = vector.broadcast %cst_88 : f32 to vector<1x256xf32>
    %240 = arith.addf %239, %238 : vector<1x256xf32>
    %241 = arith.subf %219, %233 : vector<1x256xf32>
    %cst_89 = arith.constant 1.000000e+00 : f32
    %242 = vector.broadcast %cst_89 : f32 to vector<1x256xf32>
    %243 = arith.subf %242, %241 : vector<1x256xf32>
    %244 = arith.subf %223, %237 : vector<1x256xf32>
    %cst_90 = arith.constant 1.000000e+00 : f32
    %245 = vector.broadcast %cst_90 : f32 to vector<1x256xf32>
    %246 = arith.addf %245, %244 : vector<1x256xf32>
    %247 = arith.subf %229, %237 : vector<1x256xf32>
    %cst_91 = arith.constant 1.000000e+00 : f32
    %248 = vector.broadcast %cst_91 : f32 to vector<1x256xf32>
    %249 = arith.subf %248, %247 : vector<1x256xf32>
    %250 = arith.fptosi %213 : vector<1x256xf32> to vector<1x256xi32>
    %251 = arith.fptosi %219 : vector<1x256xf32> to vector<1x256xi32>
    %252 = arith.fptosi %223 : vector<1x256xf32> to vector<1x256xi32>
    %253 = arith.fptosi %229 : vector<1x256xf32> to vector<1x256xi32>
    %254 = vector.broadcast %250 : vector<1x256xi32> to vector<16x256xi32>
    %255 = arith.cmpi eq, %3, %254 : vector<16x256xi32>
    %cst_92 = arith.constant 0.000000e+00 : f32
    %256 = vector.shape_cast %240 : vector<1x256xf32> to vector<1x256xf32>
    %257 = vector.broadcast %256 : vector<1x256xf32> to vector<16x256xf32>
    %258 = vector.broadcast %cst_92 : f32 to vector<16x256xf32>
    %259 = arith.select %255, %257, %258 : vector<16x256xi1>, vector<16x256xf32>
    %260 = vector.broadcast %251 : vector<1x256xi32> to vector<16x256xi32>
    %261 = arith.cmpi eq, %3, %260 : vector<16x256xi32>
    %cst_93 = arith.constant 0.000000e+00 : f32
    %262 = vector.shape_cast %243 : vector<1x256xf32> to vector<1x256xf32>
    %263 = vector.broadcast %262 : vector<1x256xf32> to vector<16x256xf32>
    %264 = vector.broadcast %cst_93 : f32 to vector<16x256xf32>
    %265 = arith.select %261, %263, %264 : vector<16x256xi1>, vector<16x256xf32>
    %266 = arith.addf %259, %265 : vector<16x256xf32>
    %267 = vector.broadcast %252 : vector<1x256xi32> to vector<16x256xi32>
    %268 = arith.cmpi eq, %4, %267 : vector<16x256xi32>
    %cst_94 = arith.constant 0.000000e+00 : f32
    %269 = vector.shape_cast %246 : vector<1x256xf32> to vector<1x256xf32>
    %270 = vector.broadcast %269 : vector<1x256xf32> to vector<16x256xf32>
    %271 = vector.broadcast %cst_94 : f32 to vector<16x256xf32>
    %272 = arith.select %268, %270, %271 : vector<16x256xi1>, vector<16x256xf32>
    %273 = vector.broadcast %253 : vector<1x256xi32> to vector<16x256xi32>
    %274 = arith.cmpi eq, %4, %273 : vector<16x256xi32>
    %cst_95 = arith.constant 0.000000e+00 : f32
    %275 = vector.shape_cast %249 : vector<1x256xf32> to vector<1x256xf32>
    %276 = vector.broadcast %275 : vector<1x256xf32> to vector<16x256xf32>
    %277 = vector.broadcast %cst_95 : f32 to vector<16x256xf32>
    %278 = arith.select %274, %276, %277 : vector<16x256xi1>, vector<16x256xf32>
    %279 = arith.addf %272, %278 : vector<16x256xf32>
    %cst_96 = arith.constant dense<0.000000e+00> : vector<64x256xf32>
    %280 = tpu.matmul %2, %279, %cst_96 {dimension_numbers = #tpu.dot_dimension_numbers<[1], [0], [0], [1], [0, 0, 1, 1], [], []>} : vector<64x16xf32>, vector<16x256xf32>, vector<64x256xf32> -> vector<64x256xf32>
    %281 = vector.shape_cast %280 : vector<64x256xf32> to vector<4x16x256xf32>
    %282 = vector.shape_cast %266 : vector<16x256xf32> to vector<1x16x256xf32>
    %283 = vector.broadcast %282 : vector<1x16x256xf32> to vector<4x16x256xf32>
    %284 = arith.mulf %281, %283 : vector<4x16x256xf32>
    %cst_97 = arith.constant dense<0.000000e+00> : vector<4x256xf32>
    %285 = vector.multi_reduction <add>, %284, %cst_97 [1] : vector<4x16x256xf32> to vector<4x256xf32>
    %286 = arith.index_cast %c2_i32 : i32 to index
    %c0_98 = arith.constant 0 : index
    %c0_99 = arith.constant 0 : index
    %287 = vector.load %arg9[%286, %c0_98, %c0_99] : memref<5x4x256xf32, #tpu.memory_space<vmem>>, vector<1x4x256xf32>
    %288 = vector.shape_cast %287 : vector<1x4x256xf32> to vector<4x256xf32>
    %289 = vector.shape_cast %285 : vector<4x256xf32> to vector<1x4x256xf32>
    tpu.vector_store %arg9[%286, %c0_98, %c0_99], %289 {strides = array<i32>} : memref<5x4x256xf32, #tpu.memory_space<vmem>>, vector<1x4x256xf32>,
    %c3_i32 = arith.constant 3 : i32
    %290 = arith.index_cast %c3_i32 : i32 to index
    %c0_100 = arith.constant 0 : index
    %291 = vector.load %arg3[%290, %c0_100] : memref<5x256xf32, #tpu.memory_space<vmem>>, vector<1x256xf32>
    %c0_101 = arith.constant 0 : index
    %292 = arith.index_cast %c3_i32 : i32 to index
    %c0_102 = arith.constant 0 : index
    %293 = vector.load %arg2[%c0_101, %292, %c0_102] : memref<1x10x256xf32, #tpu.memory_space<vmem>>, vector<1x1x256xf32>
    %294 = vector.shape_cast %293 : vector<1x1x256xf32> to vector<1x256xf32>
    %295 = arith.addf %291, %294 : vector<1x256xf32>
    %296 = arith.index_cast %c3_i32 : i32 to index
    %c0_103 = arith.constant 0 : index
    %297 = vector.load %arg4[%296, %c0_103] : memref<5x256xf32, #tpu.memory_space<vmem>>, vector<1x256xf32>
    %c5_i32_104 = arith.constant 5 : i32
    %298 = arith.addi %c5_i32_104, %c3_i32 : i32
    %c0_105 = arith.constant 0 : index
    %299 = arith.index_cast %298 : i32 to index
    %c0_106 = arith.constant 0 : index
    %300 = vector.load %arg2[%c0_105, %299, %c0_106] : memref<1x10x256xf32, #tpu.memory_space<vmem>>, vector<1x1x256xf32>
    %301 = vector.shape_cast %300 : vector<1x1x256xf32> to vector<1x256xf32>
    %302 = arith.addf %297, %301 : vector<1x256xf32>
    %303 = math.floor %295 : vector<1x256xf32>
    %304 = math.floor %302 : vector<1x256xf32>
    %cst_107 = arith.constant 0.000000e+00 : f32
    %cst_108 = arith.constant 1.500000e+01 : f32
    %305 = vector.broadcast %cst_107 : f32 to vector<1x256xf32>
    %306 = arith.maximumf %305, %303 : vector<1x256xf32>
    %307 = vector.broadcast %cst_108 : f32 to vector<1x256xf32>
    %308 = arith.minimumf %307, %306 : vector<1x256xf32>
    %cst_109 = arith.constant 1.000000e+00 : f32
    %309 = vector.broadcast %cst_109 : f32 to vector<1x256xf32>
    %310 = arith.addf %303, %309 : vector<1x256xf32>
    %cst_110 = arith.constant 0.000000e+00 : f32
    %cst_111 = arith.constant 1.500000e+01 : f32
    %311 = vector.broadcast %cst_110 : f32 to vector<1x256xf32>
    %312 = arith.maximumf %311, %310 : vector<1x256xf32>
    %313 = vector.broadcast %cst_111 : f32 to vector<1x256xf32>
    %314 = arith.minimumf %313, %312 : vector<1x256xf32>
    %cst_112 = arith.constant 0.000000e+00 : f32
    %cst_113 = arith.constant 1.500000e+01 : f32
    %315 = vector.broadcast %cst_112 : f32 to vector<1x256xf32>
    %316 = arith.maximumf %315, %304 : vector<1x256xf32>
    %317 = vector.broadcast %cst_113 : f32 to vector<1x256xf32>
    %318 = arith.minimumf %317, %316 : vector<1x256xf32>
    %cst_114 = arith.constant 1.000000e+00 : f32
    %319 = vector.broadcast %cst_114 : f32 to vector<1x256xf32>
    %320 = arith.addf %304, %319 : vector<1x256xf32>
    %cst_115 = arith.constant 0.000000e+00 : f32
    %cst_116 = arith.constant 1.500000e+01 : f32
    %321 = vector.broadcast %cst_115 : f32 to vector<1x256xf32>
    %322 = arith.maximumf %321, %320 : vector<1x256xf32>
    %323 = vector.broadcast %cst_116 : f32 to vector<1x256xf32>
    %324 = arith.minimumf %323, %322 : vector<1x256xf32>
    %cst_117 = arith.constant 0.000000e+00 : f32
    %cst_118 = arith.constant 1.500000e+01 : f32
    %325 = vector.broadcast %cst_117 : f32 to vector<1x256xf32>
    %326 = arith.maximumf %325, %295 : vector<1x256xf32>
    %327 = vector.broadcast %cst_118 : f32 to vector<1x256xf32>
    %328 = arith.minimumf %327, %326 : vector<1x256xf32>
    %cst_119 = arith.constant 0.000000e+00 : f32
    %cst_120 = arith.constant 1.500000e+01 : f32
    %329 = vector.broadcast %cst_119 : f32 to vector<1x256xf32>
    %330 = arith.maximumf %329, %302 : vector<1x256xf32>
    %331 = vector.broadcast %cst_120 : f32 to vector<1x256xf32>
    %332 = arith.minimumf %331, %330 : vector<1x256xf32>
    %333 = arith.subf %308, %328 : vector<1x256xf32>
    %cst_121 = arith.constant 1.000000e+00 : f32
    %334 = vector.broadcast %cst_121 : f32 to vector<1x256xf32>
    %335 = arith.addf %334, %333 : vector<1x256xf32>
    %336 = arith.subf %314, %328 : vector<1x256xf32>
    %cst_122 = arith.constant 1.000000e+00 : f32
    %337 = vector.broadcast %cst_122 : f32 to vector<1x256xf32>
    %338 = arith.subf %337, %336 : vector<1x256xf32>
    %339 = arith.subf %318, %332 : vector<1x256xf32>
    %cst_123 = arith.constant 1.000000e+00 : f32
    %340 = vector.broadcast %cst_123 : f32 to vector<1x256xf32>
    %341 = arith.addf %340, %339 : vector<1x256xf32>
    %342 = arith.subf %324, %332 : vector<1x256xf32>
    %cst_124 = arith.constant 1.000000e+00 : f32
    %343 = vector.broadcast %cst_124 : f32 to vector<1x256xf32>
    %344 = arith.subf %343, %342 : vector<1x256xf32>
    %345 = arith.fptosi %308 : vector<1x256xf32> to vector<1x256xi32>
    %346 = arith.fptosi %314 : vector<1x256xf32> to vector<1x256xi32>
    %347 = arith.fptosi %318 : vector<1x256xf32> to vector<1x256xi32>
    %348 = arith.fptosi %324 : vector<1x256xf32> to vector<1x256xi32>
    %349 = vector.broadcast %345 : vector<1x256xi32> to vector<16x256xi32>
    %350 = arith.cmpi eq, %3, %349 : vector<16x256xi32>
    %cst_125 = arith.constant 0.000000e+00 : f32
    %351 = vector.shape_cast %335 : vector<1x256xf32> to vector<1x256xf32>
    %352 = vector.broadcast %351 : vector<1x256xf32> to vector<16x256xf32>
    %353 = vector.broadcast %cst_125 : f32 to vector<16x256xf32>
    %354 = arith.select %350, %352, %353 : vector<16x256xi1>, vector<16x256xf32>
    %355 = vector.broadcast %346 : vector<1x256xi32> to vector<16x256xi32>
    %356 = arith.cmpi eq, %3, %355 : vector<16x256xi32>
    %cst_126 = arith.constant 0.000000e+00 : f32
    %357 = vector.shape_cast %338 : vector<1x256xf32> to vector<1x256xf32>
    %358 = vector.broadcast %357 : vector<1x256xf32> to vector<16x256xf32>
    %359 = vector.broadcast %cst_126 : f32 to vector<16x256xf32>
    %360 = arith.select %356, %358, %359 : vector<16x256xi1>, vector<16x256xf32>
    %361 = arith.addf %354, %360 : vector<16x256xf32>
    %362 = vector.broadcast %347 : vector<1x256xi32> to vector<16x256xi32>
    %363 = arith.cmpi eq, %4, %362 : vector<16x256xi32>
    %cst_127 = arith.constant 0.000000e+00 : f32
    %364 = vector.shape_cast %341 : vector<1x256xf32> to vector<1x256xf32>
    %365 = vector.broadcast %364 : vector<1x256xf32> to vector<16x256xf32>
    %366 = vector.broadcast %cst_127 : f32 to vector<16x256xf32>
    %367 = arith.select %363, %365, %366 : vector<16x256xi1>, vector<16x256xf32>
    %368 = vector.broadcast %348 : vector<1x256xi32> to vector<16x256xi32>
    %369 = arith.cmpi eq, %4, %368 : vector<16x256xi32>
    %cst_128 = arith.constant 0.000000e+00 : f32
    %370 = vector.shape_cast %344 : vector<1x256xf32> to vector<1x256xf32>
    %371 = vector.broadcast %370 : vector<1x256xf32> to vector<16x256xf32>
    %372 = vector.broadcast %cst_128 : f32 to vector<16x256xf32>
    %373 = arith.select %369, %371, %372 : vector<16x256xi1>, vector<16x256xf32>
    %374 = arith.addf %367, %373 : vector<16x256xf32>
    %cst_129 = arith.constant dense<0.000000e+00> : vector<64x256xf32>
    %375 = tpu.matmul %2, %374, %cst_129 {dimension_numbers = #tpu.dot_dimension_numbers<[1], [0], [0], [1], [0, 0, 1, 1], [], []>} : vector<64x16xf32>, vector<16x256xf32>, vector<64x256xf32> -> vector<64x256xf32>
    %376 = vector.shape_cast %375 : vector<64x256xf32> to vector<4x16x256xf32>
    %377 = vector.shape_cast %361 : vector<16x256xf32> to vector<1x16x256xf32>
    %378 = vector.broadcast %377 : vector<1x16x256xf32> to vector<4x16x256xf32>
    %379 = arith.mulf %376, %378 : vector<4x16x256xf32>
    %cst_130 = arith.constant dense<0.000000e+00> : vector<4x256xf32>
    %380 = vector.multi_reduction <add>, %379, %cst_130 [1] : vector<4x16x256xf32> to vector<4x256xf32>
    %381 = arith.index_cast %c3_i32 : i32 to index
    %c0_131 = arith.constant 0 : index
    %c0_132 = arith.constant 0 : index
    %382 = vector.load %arg9[%381, %c0_131, %c0_132] : memref<5x4x256xf32, #tpu.memory_space<vmem>>, vector<1x4x256xf32>
    %383 = vector.shape_cast %382 : vector<1x4x256xf32> to vector<4x256xf32>
    %384 = vector.shape_cast %380 : vector<4x256xf32> to vector<1x4x256xf32>
    tpu.vector_store %arg9[%381, %c0_131, %c0_132], %384 {strides = array<i32>} : memref<5x4x256xf32, #tpu.memory_space<vmem>>, vector<1x4x256xf32>,
    %c4_i32 = arith.constant 4 : i32
    %385 = arith.index_cast %c4_i32 : i32 to index
    %c0_133 = arith.constant 0 : index
    %386 = vector.load %arg3[%385, %c0_133] : memref<5x256xf32, #tpu.memory_space<vmem>>, vector<1x256xf32>
    %c0_134 = arith.constant 0 : index
    %387 = arith.index_cast %c4_i32 : i32 to index
    %c0_135 = arith.constant 0 : index
    %388 = vector.load %arg2[%c0_134, %387, %c0_135] : memref<1x10x256xf32, #tpu.memory_space<vmem>>, vector<1x1x256xf32>
    %389 = vector.shape_cast %388 : vector<1x1x256xf32> to vector<1x256xf32>
    %390 = arith.addf %386, %389 : vector<1x256xf32>
    %391 = arith.index_cast %c4_i32 : i32 to index
    %c0_136 = arith.constant 0 : index
    %392 = vector.load %arg4[%391, %c0_136] : memref<5x256xf32, #tpu.memory_space<vmem>>, vector<1x256xf32>
    %c5_i32_137 = arith.constant 5 : i32
    %393 = arith.addi %c5_i32_137, %c4_i32 : i32
    %c0_138 = arith.constant 0 : index
    %394 = arith.index_cast %393 : i32 to index
    %c0_139 = arith.constant 0 : index
    %395 = vector.load %arg2[%c0_138, %394, %c0_139] : memref<1x10x256xf32, #tpu.memory_space<vmem>>, vector<1x1x256xf32>
    %396 = vector.shape_cast %395 : vector<1x1x256xf32> to vector<1x256xf32>
    %397 = arith.addf %392, %396 : vector<1x256xf32>
    %398 = math.floor %390 : vector<1x256xf32>
    %399 = math.floor %397 : vector<1x256xf32>
    %cst_140 = arith.constant 0.000000e+00 : f32
    %cst_141 = arith.constant 1.500000e+01 : f32
    %400 = vector.broadcast %cst_140 : f32 to vector<1x256xf32>
    %401 = arith.maximumf %400, %398 : vector<1x256xf32>
    %402 = vector.broadcast %cst_141 : f32 to vector<1x256xf32>
    %403 = arith.minimumf %402, %401 : vector<1x256xf32>
    %cst_142 = arith.constant 1.000000e+00 : f32
    %404 = vector.broadcast %cst_142 : f32 to vector<1x256xf32>
    %405 = arith.addf %398, %404 : vector<1x256xf32>
    %cst_143 = arith.constant 0.000000e+00 : f32
    %cst_144 = arith.constant 1.500000e+01 : f32
    %406 = vector.broadcast %cst_143 : f32 to vector<1x256xf32>
    %407 = arith.maximumf %406, %405 : vector<1x256xf32>
    %408 = vector.broadcast %cst_144 : f32 to vector<1x256xf32>
    %409 = arith.minimumf %408, %407 : vector<1x256xf32>
    %cst_145 = arith.constant 0.000000e+00 : f32
    %cst_146 = arith.constant 1.500000e+01 : f32
    %410 = vector.broadcast %cst_145 : f32 to vector<1x256xf32>
    %411 = arith.maximumf %410, %399 : vector<1x256xf32>
    %412 = vector.broadcast %cst_146 : f32 to vector<1x256xf32>
    %413 = arith.minimumf %412, %411 : vector<1x256xf32>
    %cst_147 = arith.constant 1.000000e+00 : f32
    %414 = vector.broadcast %cst_147 : f32 to vector<1x256xf32>
    %415 = arith.addf %399, %414 : vector<1x256xf32>
    %cst_148 = arith.constant 0.000000e+00 : f32
    %cst_149 = arith.constant 1.500000e+01 : f32
    %416 = vector.broadcast %cst_148 : f32 to vector<1x256xf32>
    %417 = arith.maximumf %416, %415 : vector<1x256xf32>
    %418 = vector.broadcast %cst_149 : f32 to vector<1x256xf32>
    %419 = arith.minimumf %418, %417 : vector<1x256xf32>
    %cst_150 = arith.constant 0.000000e+00 : f32
    %cst_151 = arith.constant 1.500000e+01 : f32
    %420 = vector.broadcast %cst_150 : f32 to vector<1x256xf32>
    %421 = arith.maximumf %420, %390 : vector<1x256xf32>
    %422 = vector.broadcast %cst_151 : f32 to vector<1x256xf32>
    %423 = arith.minimumf %422, %421 : vector<1x256xf32>
    %cst_152 = arith.constant 0.000000e+00 : f32
    %cst_153 = arith.constant 1.500000e+01 : f32
    %424 = vector.broadcast %cst_152 : f32 to vector<1x256xf32>
    %425 = arith.maximumf %424, %397 : vector<1x256xf32>
    %426 = vector.broadcast %cst_153 : f32 to vector<1x256xf32>
    %427 = arith.minimumf %426, %425 : vector<1x256xf32>
    %428 = arith.subf %403, %423 : vector<1x256xf32>
    %cst_154 = arith.constant 1.000000e+00 : f32
    %429 = vector.broadcast %cst_154 : f32 to vector<1x256xf32>
    %430 = arith.addf %429, %428 : vector<1x256xf32>
    %431 = arith.subf %409, %423 : vector<1x256xf32>
    %cst_155 = arith.constant 1.000000e+00 : f32
    %432 = vector.broadcast %cst_155 : f32 to vector<1x256xf32>
    %433 = arith.subf %432, %431 : vector<1x256xf32>
    %434 = arith.subf %413, %427 : vector<1x256xf32>
    %cst_156 = arith.constant 1.000000e+00 : f32
    %435 = vector.broadcast %cst_156 : f32 to vector<1x256xf32>
    %436 = arith.addf %435, %434 : vector<1x256xf32>
    %437 = arith.subf %419, %427 : vector<1x256xf32>
    %cst_157 = arith.constant 1.000000e+00 : f32
    %438 = vector.broadcast %cst_157 : f32 to vector<1x256xf32>
    %439 = arith.subf %438, %437 : vector<1x256xf32>
    %440 = arith.fptosi %403 : vector<1x256xf32> to vector<1x256xi32>
    %441 = arith.fptosi %409 : vector<1x256xf32> to vector<1x256xi32>
    %442 = arith.fptosi %413 : vector<1x256xf32> to vector<1x256xi32>
    %443 = arith.fptosi %419 : vector<1x256xf32> to vector<1x256xi32>
    %444 = vector.broadcast %440 : vector<1x256xi32> to vector<16x256xi32>
    %445 = arith.cmpi eq, %3, %444 : vector<16x256xi32>
    %cst_158 = arith.constant 0.000000e+00 : f32
    %446 = vector.shape_cast %430 : vector<1x256xf32> to vector<1x256xf32>
    %447 = vector.broadcast %446 : vector<1x256xf32> to vector<16x256xf32>
    %448 = vector.broadcast %cst_158 : f32 to vector<16x256xf32>
    %449 = arith.select %445, %447, %448 : vector<16x256xi1>, vector<16x256xf32>
    %450 = vector.broadcast %441 : vector<1x256xi32> to vector<16x256xi32>
    %451 = arith.cmpi eq, %3, %450 : vector<16x256xi32>
    %cst_159 = arith.constant 0.000000e+00 : f32
    %452 = vector.shape_cast %433 : vector<1x256xf32> to vector<1x256xf32>
    %453 = vector.broadcast %452 : vector<1x256xf32> to vector<16x256xf32>
    %454 = vector.broadcast %cst_159 : f32 to vector<16x256xf32>
    %455 = arith.select %451, %453, %454 : vector<16x256xi1>, vector<16x256xf32>
    %456 = arith.addf %449, %455 : vector<16x256xf32>
    %457 = vector.broadcast %442 : vector<1x256xi32> to vector<16x256xi32>
    %458 = arith.cmpi eq, %4, %457 : vector<16x256xi32>
    %cst_160 = arith.constant 0.000000e+00 : f32
    %459 = vector.shape_cast %436 : vector<1x256xf32> to vector<1x256xf32>
    %460 = vector.broadcast %459 : vector<1x256xf32> to vector<16x256xf32>
    %461 = vector.broadcast %cst_160 : f32 to vector<16x256xf32>
    %462 = arith.select %458, %460, %461 : vector<16x256xi1>, vector<16x256xf32>
    %463 = vector.broadcast %443 : vector<1x256xi32> to vector<16x256xi32>
    %464 = arith.cmpi eq, %4, %463 : vector<16x256xi32>
    %cst_161 = arith.constant 0.000000e+00 : f32
    %465 = vector.shape_cast %439 : vector<1x256xf32> to vector<1x256xf32>
    %466 = vector.broadcast %465 : vector<1x256xf32> to vector<16x256xf32>
    %467 = vector.broadcast %cst_161 : f32 to vector<16x256xf32>
    %468 = arith.select %464, %466, %467 : vector<16x256xi1>, vector<16x256xf32>
    %469 = arith.addf %462, %468 : vector<16x256xf32>
    %cst_162 = arith.constant dense<0.000000e+00> : vector<64x256xf32>
    %470 = tpu.matmul %2, %469, %cst_162 {dimension_numbers = #tpu.dot_dimension_numbers<[1], [0], [0], [1], [0, 0, 1, 1], [], []>} : vector<64x16xf32>, vector<16x256xf32>, vector<64x256xf32> -> vector<64x256xf32>
    %471 = vector.shape_cast %470 : vector<64x256xf32> to vector<4x16x256xf32>
    %472 = vector.shape_cast %456 : vector<16x256xf32> to vector<1x16x256xf32>
    %473 = vector.broadcast %472 : vector<1x16x256xf32> to vector<4x16x256xf32>
    %474 = arith.mulf %471, %473 : vector<4x16x256xf32>
    %cst_163 = arith.constant dense<0.000000e+00> : vector<4x256xf32>
    %475 = vector.multi_reduction <add>, %474, %cst_163 [1] : vector<4x16x256xf32> to vector<4x256xf32>
    %476 = arith.index_cast %c4_i32 : i32 to index
    %c0_164 = arith.constant 0 : index
    %c0_165 = arith.constant 0 : index
    %477 = vector.load %arg9[%476, %c0_164, %c0_165] : memref<5x4x256xf32, #tpu.memory_space<vmem>>, vector<1x4x256xf32>
    %478 = vector.shape_cast %477 : vector<1x4x256xf32> to vector<4x256xf32>
    %479 = vector.shape_cast %475 : vector<4x256xf32> to vector<1x4x256xf32>
    tpu.vector_store %arg9[%476, %c0_164, %c0_165], %479 {strides = array<i32>} : memref<5x4x256xf32, #tpu.memory_space<vmem>>, vector<1x4x256xf32>,
    %c5_i32_166 = arith.constant 5 : i32
    %c0_167 = arith.constant 0 : index
    %c0_168 = arith.constant 0 : index
    %c0_169 = arith.constant 0 : index
    %480 = vector.load %arg9[%c0_167, %c0_168, %c0_169] : memref<5x4x256xf32, #tpu.memory_space<vmem>>, vector<5x4x256xf32>
    %481 = vector.shape_cast %480 : vector<5x4x256xf32> to vector<20x256xf32>
    %c0_170 = arith.constant 0 : index
    %c0_171 = arith.constant 0 : index
    %482 = vector.load %arg5[%c0_170, %c0_171] : memref<8x20xf32, #tpu.memory_space<vmem>>, vector<8x20xf32>
    %cst_172 = arith.constant dense<0.000000e+00> : vector<8x256xf32>
    %483 = tpu.matmul %482, %481, %cst_172 {dimension_numbers = #tpu.dot_dimension_numbers<[1], [0], [0], [1], [0, 0, 1, 1], [], []>} : vector<8x20xf32>, vector<20x256xf32>, vector<8x256xf32> -> vector<8x256xf32>
    %c0_173 = arith.constant 0 : index
    %c0_174 = arith.constant 0 : index
    %484 = vector.load %arg6[%c0_173, %c0_174] : memref<8x1xf32, #tpu.memory_space<vmem>>, vector<8x1xf32>
    %485 = vector.broadcast %484 : vector<8x1xf32> to vector<8x256xf32>
    %486 = arith.mulf %483, %485 : vector<8x256xf32>
    %c0_175 = arith.constant 0 : index
    %c0_176 = arith.constant 0 : index
    %487 = vector.load %arg7[%c0_175, %c0_176] : memref<8x1xf32, #tpu.memory_space<vmem>>, vector<8x1xf32>
    %488 = vector.broadcast %487 : vector<8x1xf32> to vector<8x256xf32>
    %489 = arith.addf %486, %488 : vector<8x256xf32>
    %490 = arith.negf %489 : vector<8x256xf32>
    %491 = math.exp %490 : vector<8x256xf32>
    %cst_177 = arith.constant 1.000000e+00 : f32
    %492 = vector.broadcast %cst_177 : f32 to vector<8x256xf32>
    %493 = arith.addf %492, %491 : vector<8x256xf32>
    %494 = arith.divf %492, %493 : vector<8x256xf32>
    %495 = arith.mulf %489, %494 : vector<8x256xf32>
    %c0_178 = arith.constant 0 : index
    %c0_179 = arith.constant 0 : index
    %c0_180 = arith.constant 0 : index
    %496 = vector.load %arg8[%c0_178, %c0_179, %c0_180] : memref<1x8x256xf32, #tpu.memory_space<vmem>>, vector<1x8x256xf32>
    %497 = vector.shape_cast %496 : vector<1x8x256xf32> to vector<8x256xf32>
    %498 = vector.shape_cast %495 : vector<8x256xf32> to vector<1x8x256xf32>
    tpu.vector_store %arg8[%c0_178, %c0_179, %c0_180], %498 {strides = array<i32>} : memref<1x8x256xf32, #tpu.memory_space<vmem>>, vector<1x8x256xf32>,
    return
  }
  func.func @transform_0(%arg0: i32) -> (i32, i32, i32, i32) {
    %c0_i32 = arith.constant 0 : i32
    %c0_i32_0 = arith.constant 0 : i32
    %c0_i32_1 = arith.constant 0 : i32
    %c0_i32_2 = arith.constant 0 : i32
    return %arg0, %c0_i32, %c0_i32_0, %c0_i32_1 : i32, i32, i32, i32
  }
  func.func @transform_1(%arg0: i32) -> (i32, i32, i32) {
    %c0_i32 = arith.constant 0 : i32
    %c0_i32_0 = arith.constant 0 : i32
    %c0_i32_1 = arith.constant 0 : i32
    return %arg0, %c0_i32, %c0_i32_0 : i32, i32, i32
  }
  func.func @transform_2(%arg0: i32) -> (i32, i32) {
    %c0_i32 = arith.constant 0 : i32
    %c0_i32_0 = arith.constant 0 : i32
    %c0_i32_1 = arith.constant 0 : i32
    return %c0_i32, %c0_i32_0 : i32, i32
  }
  func.func @transform_3(%arg0: i32) -> (i32, i32) {
    %c0_i32 = arith.constant 0 : i32
    %c0_i32_0 = arith.constant 0 : i32
    %c0_i32_1 = arith.constant 0 : i32
    return %c0_i32, %c0_i32_0 : i32, i32
  }
  func.func @transform_4(%arg0: i32) -> (i32, i32) {
    %c0_i32 = arith.constant 0 : i32
    %c0_i32_0 = arith.constant 0 : i32
    %c0_i32_1 = arith.constant 0 : i32
    return %c0_i32, %c0_i32_0 : i32, i32
  }
  func.func @transform_5(%arg0: i32) -> (i32, i32) {
    %c0_i32 = arith.constant 0 : i32
    %c0_i32_0 = arith.constant 0 : i32
    %c0_i32_1 = arith.constant 0 : i32
    return %c0_i32, %c0_i32_0 : i32, i32
  }
  func.func @transform_6(%arg0: i32) -> (i32, i32) {
    %c0_i32 = arith.constant 0 : i32
    %c0_i32_0 = arith.constant 0 : i32
    %c0_i32_1 = arith.constant 0 : i32
    return %c0_i32, %c0_i32_0 : i32, i32
  }
  func.func @transform_7(%arg0: i32) -> (i32, i32, i32) {
    %c0_i32 = arith.constant 0 : i32
    %c0_i32_0 = arith.constant 0 : i32
    %c0_i32_1 = arith.constant 0 : i32
    return %arg0, %c0_i32, %c0_i32_0 : i32, i32, i32
  }
}

</mosaic_0001>

<bundles_post_ra>
// kernel: akconv_forward.1
= control target key start
LH: loop header
LB: loop body
LE: loop exit
PB: predicated region body
PF: predicated region fallthrough
CT: control target
= control target key end

     0   :  { %s2542_s24 = smov 0   ;;  %s3340_s0 = inlined_call_operand.vmem [shape: f32[2,4,16,16], index: 0, kind: input, shape index: {}]   ;;  %s3341_s1 = inlined_call_operand.vmem [shape: f32[2,10,256], index: 1, kind: input, shape index: {}]   ;;  %s3342_s2 = inlined_call_operand.vmem [shape: f32[5,256], index: 2, kind: input, shape index: {}]   ;;  %s3343_s3 = inlined_call_operand.vmem [shape: f32[5,256], index: 3, kind: input, shape index: {}]   ;;  %s3344_s4 = inlined_call_operand.vmem [shape: f32[8,20], index: 4, kind: input, shape index: {}]   ;;  %s3345_s5 = inlined_call_operand.vmem [shape: f32[8,1], index: 5, kind: input, shape index: {}]   ;;  %s3346_s6 = inlined_call_operand.vmem [shape: f32[8,1], index: 6, kind: input, shape index: {}]   ;;  %s3347_s7 = inlined_call_operand.vmem [shape: f32[2,8,256], index: 7, kind: output, shape index: {}]  }
   0x1 LB: > { %s2351_s25 = sadd.s32 4294967295, %s2498_s24   ;;  %p2355_p0 = scmp.ge.s32.totalorder %s2498_s24, 1  ;;  %s2498_s24 = sphi %s2542_s24, %s17_s24  }
   0x2   : > { %p247_p1 = scmp.lt.s32.totalorder %s2498_s24, 3 }
   0x4   : > { %p248_p2 = pnand %p2355_p0, %p247_p1 }
   0x6   : > { %251 = sbr.rel (%p248_p2) target bundleno = 593 (0x251), region = 48 }
   0xb   : > { %p284_p3 = scmp.lt.s32.totalorder %s2351_s25, 1  ;;  %v2500_v0 = vmov 0.0   ;;  %v307_v1 = vlaneseq  ;;  %v313_v2 = vld [vmem:[%s3343_s3] ss:$8 sm:$0x3]  ;;  %vm461_vm0 = vcmask 130048  }
   0xc   : > { %550 = vmatprep.mubr.f32.mxu0 %v2500_v0  ;;  %580 = vmatprep.mubr.f32.mxu1 %v2500_v0  ;;  %v2373_v3 = vld [vmem:[%s3343_s3 + $0x1] ss:$8 sm:$0x3]  ;;  %v2385_v7 = vld [vmem:[%s3343_s3 + $0x2] ss:$8 sm:$0x3] }
   0xd   : > { %s3353_s25 = smov (!%p284_p3, %s2351_s25), 1  ;;  %v2566_v4 = vshrl.u32 %v307_v1, 7  ;;  %v2397_v9 = vld [vmem:[%s3343_s3 + $0x3] ss:$8 sm:$0x3] }
   0xe   : > { %s2427_s26 = sshll.u32 %s3353_s25, 5  ;;  %s2426_s15 = sshll.u32 %s3353_s25, 6 }
   0xf   : > { %s2561_s8 = scalar_lea.vmem %s3341_s1, %s2427_s26  ;;  %v2578_v14 = vadd.s32 8, %v2566_v4  ;;  %v2581_v15 = vsub.s32 1, %v2566_v4  ;;  %v2584_v16 = vsub.s32 0, %v2566_v4  ;;  %s2616_s18 = scalar_lea.vmem %s3340_s0, %s2426_s15 }
  0x10   : > { %v2362_v5 = vld [vmem:[%s2561_s8 + $0x5] ss:$8 sm:$0x3]  ;;  %v2374_v8 = vld [vmem:[%s2561_s8 + $0x6] ss:$8 sm:$0x3] }
  0x11   : > { %v316_v6 = vadd.f32 %v2362_v5, %v313_v2  ;;  %v709_v12 = vadd.f32 %v2374_v8, %v2373_v3  ;;  %v2386_v13 = vld [vmem:[%s2561_s8 + $0x7] ss:$8 sm:$0x3]  ;;  %v2398_v18 = vld [vmem:[%s2561_s8 + $0x10] ss:$8 sm:$0x3] }
  0x12   : > { %v1072_v17 = vadd.f32 %v2386_v13, %v2385_v7  ;;  %v2587_v26 = vadd.f32 %v2398_v18, %v2397_v9  ;;  %s2428_s16 = sshll.u32 %s3353_s25, 4 }
  0x13   : > { %v318_v10 = vfloor.f32 %v316_v6  ;;  %v331_v11 = vmax.f32 %v316_v6, 0.0  ;;  %v711_v22 = vfloor.f32 %v709_v12  ;;  %v724_v23 = vmax.f32 %v709_v12, 0.0  ;;  %s298_s19 = scalar_lea.vmem %s3347_s7, %s2428_s16 }
  0x14   : > { %v1074_v24 = vfloor.f32 %v1072_v17  ;;  %v1087_v25 = vmax.f32 %v1072_v17, 0.0  ;;  %v1437_v42 = vfloor.f32 %v2587_v26 }
  0x15   : > { %v324_v19 = vmax.f32 %v318_v10, 0.0  ;;  %v326_v20 = vadd.f32 1.0, %v318_v10  ;;  %v332_v21 = vmin.f32 %v331_v11, 15.0  ;;  %v717_v29 = vmax.f32 %v711_v22, 0.0 }
  0x16   : > { %v719_v30 = vadd.f32 1.0, %v711_v22  ;;  %v725_v31 = vmin.f32 %v724_v23, 15.0  ;;  %v2589_v32 = vmax.f32 %v1074_v24, 0.0  ;;  %v1082_v33 = vadd.f32 1.0, %v1074_v24  ;;  %v2625_v22 = vld [vmem:[%s2616_s18 + $0x28] sm:$0xff] }
  0x17   : > { %v325_v27 = vmin.f32 %v324_v19, 15.0  ;;  %v327_v28 = vmax.f32 %v326_v20, 0.0  ;;  %v2591_v34 = vmin.f32 %v1087_v25, 15.0  ;;  %v718_v38 = vmin.f32 %v717_v29, 15.0 }
  0x18   : > { %v720_v39 = vmax.f32 %v719_v30, 0.0  ;;  %v1081_v40 = vmin.f32 %v2589_v32, 15.0  ;;  %v1083_v41 = vmax.f32 %v1082_v33, 0.0 }
  0x19   : > { %v328_v35 = vmin.f32 %v327_v28, 15.0  ;;  %v337_v36 = vsub.f32 %v325_v27, %v332_v21  ;;  %v2437_v37 = vtrunc.f32 %v325_v27  ;;  %v730_v48 = vsub.f32 %v718_v38, %v725_v31 }
  0x1a   : > { %v721_v47 = vmin.f32 %v720_v39, 15.0  ;;  %v2445_v49 = vtrunc.f32 %v718_v38  ;;  %v2595_v50 = vmin.f32 %v1083_v41, 15.0  ;;  %v2453_v25 = vtrunc.f32 %v1081_v40 }
  0x1b   : > { %v338_v43 = vadd.f32 1.0, %v337_v36  ;;  %v339_v44 = vsub.f32 %v328_v35, %v332_v21  ;;  %v2438_v45 = vcvt.f32.s32 %v2437_v37  ;;  %v2439_v46 = vtrunc.f32 %v328_v35  ;;  %v2622_v21 = vld [vmem:[%s2616_s18] sm:$0xff]  ;;  %v2650_v37 = vld [vmem:[%s2616_s18 + $0x8] sm:$0xff] }
  0x1c   : > { %v731_v57 = vadd.f32 1.0, %v730_v48  ;;  %v732_v58 = vsub.f32 %v721_v47, %v725_v31  ;;  %v2446_v12 = vcvt.f32.s32 %v2445_v49  ;;  %v2447_v17 = vtrunc.f32 %v721_v47 }
  0x1d   : > { %v340_v51 = vsub.f32 1.0, %v339_v44  ;;  %v2440_v52 = vcvt.f32.s32 %v2439_v46  ;;  %v410_v53 = vrot.slane %v2438_v45, %v2581_v15  ;;  %v423_v54 = vrot.slane %v338_v43, %v2581_v15 }
  0x1e   : > { %v406_v55 = vrot.slane %v2438_v45, %v2584_v16  ;;  %v419_v56 = vrot.slane %v338_v43, %v2584_v16  ;;  %v733_v11 = vsub.f32 1.0, %v732_v58  ;;  %v816_v18 = vrot.slane %v731_v57, %v2581_v15 }
  0x1f   : > { %vm414_vm1 = vcmp.eq.s32.totalorder %v2578_v14, %v410_v53  ;;  %v437_v59 = vrot.slane %v2440_v52, %v2581_v15  ;;  %v450_v60 = vrot.slane %v340_v51, %v2581_v15  ;;  %v433_v61 = vrot.slane %v2440_v52, %v2584_v16  ;;  %v2670_v52 = vld [vmem:[%s2616_s18 + $0x38] sm:$0xff] }
  0x20   : > { %v429_v62 = vsel %vm414_vm1, %v423_v54, 0.0  ;;  %vm413_vm2 = vcmp.eq.s32.totalorder %v2578_v14, %v406_v55  ;;  %v446_v63 = vrot.slane %v340_v51, %v2584_v16  ;;  %vm412_vm3 = vcmp.eq.s32.totalorder %v2566_v4, %v410_v53  ;;  %v2667_v51 = vld [vmem:[%s2616_s18 + $0x10] sm:$0xff] }
  0x21   : > { %vm441_vm4 = vcmp.eq.s32.totalorder %v2578_v14, %v437_v59  ;;  %v428_v1 = vsel %vm413_vm2, %v419_v56, 0.0  ;;  %vm440_vm5 = vcmp.eq.s32.totalorder %v2578_v14, %v433_v61  ;;  %v427_v2 = vsel %vm412_vm3, %v423_v54, 0.0 }
  0x22   : > { %v456_v3 = vsel %vm441_vm4, %v450_v60, 0.0  ;;  %v455_v5 = vsel %vm440_vm5, %v446_v63, 0.0  ;;  %vm439_vm6 = vcmp.eq.s32.totalorder %v2566_v4, %v437_v59  ;;  %vm411_vm7 = vcmp.eq.s32.totalorder %v2566_v4, %v406_v55 }
  0x23   : > { %v460_v6 = vadd.f32 %v456_v3, %v429_v62  ;;  %v459_v7 = vadd.f32 %v455_v5, %v428_v1  ;;  %v454_v8 = vsel %vm439_vm6, %v450_v60, 0.0  ;;  %v426_v9 = vsel %vm411_vm7, %v419_v56, 0.0  ;;  %v2691_v1 = vld [vmem:[%s2616_s18 + $0x18] sm:$0xff] }
  0x24   : > { %v458_v10 = vadd.f32 %v454_v8, %v427_v2  ;;  %vm438_vm8 = vcmp.eq.s32.totalorder %v2566_v4, %v433_v61  ;;  %v812_v19 = vrot.slane %v731_v57, %v2584_v16  ;;  %v803_v23 = vrot.slane %v2446_v12, %v2581_v15 }
  0x25   : > { %514 = vmatprep.subr.mxu0 %v460_v6  ;;  %2429 = vmatprep.subr.mxu1 %v460_v6  ;;  %v453_v13 = vsel %vm438_vm8, %v446_v63, 0.0  ;;  %v843_v24 = vrot.slane %v733_v11, %v2581_v15  ;;  %v2448_v27 = vcvt.f32.s32 %v2447_v17  ;;  %v799_v28 = vrot.slane %v2446_v12, %v2584_v16  ;;  %v2410_v12 = vld [vmem:[%s2561_s8 + $0x11] ss:$8 sm:$0x3] }
  0x26   : > { %515 = vmatpush1.msra.mxu0 %v459_v7  ;;  %2431 = vmatpush1.msra.mxu1 %v459_v7  ;;  %v457_v20 = vadd.f32 %v453_v13, %v426_v9  ;;  %v839_v29 = vrot.slane %v733_v11, %v2584_v16  ;;  %v1093_v30 = vsub.f32 %v1081_v40, %v2591_v34  ;;  %v2454_v33 = vcvt.f32.s32 %v2453_v25  ;;  %v2409_v11 = vld [vmem:[%s3343_s3 + $0x4] ss:$8 sm:$0x3] }
  0x27   : > { %516 = vmatprep.subr.mxu0 %v458_v10  ;;  %2430 = vmatprep.subr.mxu1 %v458_v10  ;;  %vm807_vm9 = vcmp.eq.s32.totalorder %v2578_v14, %v803_v23  ;;  %vm805_vm10 = vcmp.eq.s32.totalorder %v2566_v4, %v803_v23  ;;  %v1095_v31 = vsub.f32 %v2595_v50, %v2591_v34  ;;  %v2653_v34 = vld [vmem:[%s2616_s18 + $0x30] sm:$0xff]  ;;  %v2455_v55 = vtrunc.f32 %v2595_v50 }
  0x28   : > { %517 = vmatpush1.msra.mxu0 %v457_v20  ;;  %2432 = vmatpush1.msra.mxu1 %v457_v20  ;;  %v822_v32 = vsel %vm807_vm9, %v816_v18, 0.0  ;;  %v830_v35 = vrot.slane %v2448_v27, %v2581_v15  ;;  %vm806_vm11 = vcmp.eq.s32.totalorder %v2578_v14, %v799_v28  ;;  %v826_v36 = vrot.slane %v2448_v27, %v2584_v16 }
  0x29   : > { %2363 = vmatmul.mubr.msk.f32.vlgmr.msra.gmra.mxu0 %vm461_vm0, %v2622_v21  ;;  %2368 = vmatmul.mubr.msk.f32.vlgmr.msra.gmra.mxu1 %vm461_vm0, %v2625_v22  ;;  %v821_v38 = vsel %vm806_vm11, %v812_v19, 0.0  ;;  %v820_v39 = vsel %vm805_vm10, %v816_v18, 0.0  ;;  %vm804_vm12 = vcmp.eq.s32.totalorder %v2566_v4, %v799_v28  ;;  %v1094_v40 = vadd.f32 1.0, %v1093_v30  ;;  %v2714_v18 = vld [vmem:[%s2616_s18 + $0x20] sm:$0xff] }
  0x2a   : > { %556 = vmatprep.mubr.f32.mxu0 %v2500_v0  ;;  %586 = vmatprep.mubr.f32.mxu1 %v2500_v0  ;;  %vm834_vm13 = vcmp.eq.s32.totalorder %v2578_v14, %v830_v35  ;;  %vm833_vm14 = vcmp.eq.s32.totalorder %v2578_v14, %v826_v36  ;;  %vm832_vm15 = vcmp.eq.s32.totalorder %v2566_v4, %v830_v35  ;;  %v819_v41 = vsel %vm804_vm12, %v812_v19, 0.0 }
  0x2b   : > { %v849_v43 = vsel %vm834_vm13, %v843_v24, 0.0  ;;  %v848_v44 = vsel %vm833_vm14, %v839_v29, 0.0  ;;  %v847_v45 = vsel %vm832_vm15, %v843_v24, 0.0  ;;  %vm831_vm1 = vcmp.eq.s32.totalorder %v2566_v4, %v826_v36 }
  0x2c   : > { %v853_v46 = vadd.f32 %v849_v43, %v822_v32  ;;  %v852_v47 = vadd.f32 %v848_v44, %v821_v38  ;;  %v851_v48 = vadd.f32 %v847_v45, %v820_v39  ;;  %v846_v49 = vsel %vm831_vm1, %v839_v29, 0.0 }
  0x2d   : > { %2364 = vmatmul.mubr.msk.f32.gmra.mxu0 %vm461_vm0, %v2650_v37  ;;  %2369 = vmatmul.mubr.msk.f32.gmra.mxu1 %vm461_vm0, %v2653_v34  ;;  %v850_v53 = vadd.f32 %v846_v49, %v819_v41  ;;  %v1096_v54 = vsub.f32 1.0, %v1095_v31  ;;  %v1166_v56 = vrot.slane %v2454_v33, %v2581_v15  ;;  %v1179_v57 = vrot.slane %v1094_v40, %v2581_v15 }
  0x2e   : > { %562 = vmatprep.mubr.f32.mxu0 %v2500_v0  ;;  %592 = vmatprep.mubr.f32.mxu1 %v2500_v0  ;;  %v1162_v58 = vrot.slane %v2454_v33, %v2584_v16  ;;  %v1175_v59 = vrot.slane %v1094_v40, %v2584_v16  ;;  %v1443_v60 = vmax.f32 %v1437_v42, 0.0  ;;  %v2456_v61 = vcvt.f32.s32 %v2455_v55 }
  0x2f   : > { %882 = vmatprep.subr.mxu1 %v853_v46  ;;  %vm1170_vm2 = vcmp.eq.s32.totalorder %v2578_v14, %v1166_v56  ;;  %v1206_v62 = vrot.slane %v1096_v54, %v2581_v15  ;;  %v1202_v50 = vrot.slane %v1096_v54, %v2584_v16  ;;  %vm1168_vm4 = vcmp.eq.s32.totalorder %v2566_v4, %v1166_v56 }
  0x30   : > { %883 = vmatpush1.msra.mxu1 %v852_v47  ;;  %v1185_v63 = vsel %vm1170_vm2, %v1179_v57, 0.0  ;;  %vm1169_vm3 = vcmp.eq.s32.totalorder %v2578_v14, %v1162_v58  ;;  %vm1167_vm5 = vcmp.eq.s32.totalorder %v2566_v4, %v1162_v58  ;;  %v1193_v2 = vrot.slane %v2456_v61, %v2581_v15 }
  0x31   : > { %2365 = vmatmul.mubr.msk.f32.gmra.mxu0 %vm461_vm0, %v2667_v51  ;;  %2370 = vmatmul.mubr.msk.f32.gmra.mxu1 %vm461_vm0, %v2670_v52  ;;  %v1184_v3 = vsel %vm1169_vm3, %v1175_v59, 0.0  ;;  %v1189_v5 = vrot.slane %v2456_v61, %v2584_v16  ;;  %v1183_v6 = vsel %vm1168_vm4, %v1179_v57, 0.0  ;;  %v1182_v7 = vsel %vm1167_vm5, %v1175_v59, 0.0 }
  0x32   : > { %884 = vmatprep.subr.mxu1 %v851_v48  ;;  %568 = vmatprep.mubr.f32.mxu0 %v2500_v0  ;;  %v1444_v8 = vmin.f32 %v1443_v60, 15.0  ;;  %v1445_v9 = vadd.f32 1.0, %v1437_v42  ;;  %v1450_v10 = vmax.f32 %v2587_v26, 0.0  ;;  %vm1197_vm6 = vcmp.eq.s32.totalorder %v2578_v14, %v1193_v2 }
  0x33   : > { %885 = vmatpush1.msra.mxu1 %v850_v53  ;;  %918 = vmatprep.mubr.f32.mxu1 %v2500_v0  ;;  %vm1196_vm7 = vcmp.eq.s32.totalorder %v2578_v14, %v1189_v5  ;;  %vm1195_vm8 = vcmp.eq.s32.totalorder %v2566_v4, %v1193_v2  ;;  %vm1194_vm9 = vcmp.eq.s32.totalorder %v2566_v4, %v1189_v5  ;;  %v1212_v26 = vsel %vm1197_vm6, %v1206_v62, 0.0 }
  0x34   : > { %v1211_v42 = vsel %vm1196_vm7, %v1202_v50, 0.0  ;;  %v1210_v13 = vsel %vm1195_vm8, %v1206_v62, 0.0  ;;  %v1209_v17 = vsel %vm1194_vm9, %v1202_v50, 0.0  ;;  %v1216_v19 = vadd.f32 %v1212_v26, %v1185_v63 }
  0x35   : > { %2366 = vmatmul.mubr.msk.f32.gmra.mxu0 %vm461_vm0, %v2691_v1  ;;  %2375 = vmatmul.mubr.msk.f32.vlgmr.msra.gmra.mxu1 %vm461_vm0, %v2622_v21  ;;  %v1215_v20 = vadd.f32 %v1211_v42, %v1184_v3  ;;  %v1446_v23 = vmax.f32 %v1445_v9, 0.0  ;;  %v1214_v24 = vadd.f32 %v1210_v13, %v1183_v6  ;;  %v1451_v25 = vmin.f32 %v1450_v10, 15.0 }
  0x36   : > { %574 = vmatprep.mubr.f32.mxu0 %v2500_v0  ;;  %924 = vmatprep.mubr.f32.mxu1 %v2500_v0  ;;  %v2461_v27 = vtrunc.f32 %v1444_v8  ;;  %v1798_v28 = vadd.f32 %v2410_v12, %v2409_v11  ;;  %v1213_v29 = vadd.f32 %v1209_v17, %v1182_v7 }
  0x37   : > { %1245 = vmatprep.subr.mxu0 %v1216_v19  ;;  %v1447_v30 = vmin.f32 %v1446_v23, 15.0  ;;  %v1456_v31 = vsub.f32 %v1444_v8, %v1451_v25 }
  0x38   : > { %v2462_v33 = vcvt.f32.s32 %v2461_v27  ;;  %v1800_v32 = vfloor.f32 %v1798_v28  ;;  %v1813_v35 = vmax.f32 %v1798_v28, 0.0  ;;  %1246 = vmatpush1.msra.mxu0 %v1215_v20 }
  0x39   : > { %2367 = vmatmul.mubr.msk.f32.gmra.mxu0 %vm461_vm0, %v2714_v18  ;;  %2376 = vmatmul.mubr.msk.f32.gmra.mxu1 %vm461_vm0, %v2650_v37  ;;  %v1458_v36 = vsub.f32 %v1447_v30, %v1451_v25  ;;  %v2463_v38 = vtrunc.f32 %v1447_v30  ;;  %v1457_v39 = vadd.f32 1.0, %v1456_v31 }
  0x3a   : > { %930 = vmatprep.mubr.f32.mxu1 %v2500_v0  ;;  %1247 = vmatprep.subr.mxu0 %v1214_v24  ;;  %v1529_v40 = vrot.slane %v2462_v33, %v2581_v15  ;;  %v1525_v41 = vrot.slane %v2462_v33, %v2584_v16  ;;  %v1806_v43 = vmax.f32 %v1800_v32, 0.0  ;;  %v1808_v46 = vadd.f32 1.0, %v1800_v32 }
  0x3b   : > { %1281 = vmatprep.mubr.f32.mxu0 %v2500_v0  ;;  %1248 = vmatpush1.msra.mxu0 %v1213_v29  ;;  %v1459_v44 = vsub.f32 1.0, %v1458_v36  ;;  %v2464_v45 = vcvt.f32.s32 %v2463_v38  ;;  %v1814_v47 = vmin.f32 %v1813_v35, 15.0  ;;  %v1542_v48 = vrot.slane %v1457_v39, %v2581_v15 }
  0x3c   : > { %vm1533_vm10 = vcmp.eq.s32.totalorder %v2578_v14, %v1529_v40  ;;  %vm1532_vm11 = vcmp.eq.s32.totalorder %v2578_v14, %v1525_v41  ;;  %v1807_v49 = vmin.f32 %v1806_v43, 15.0  ;;  %v1538_v55 = vrot.slane %v1457_v39, %v2584_v16 }
  0x3d   : > { %2377 = vmatmul.mubr.msk.f32.gmra.mxu1 %vm461_vm0, %v2667_v51  ;;  %2387 = vmatmul.mubr.msk.f32.vlgmr.msra.gmra.mxu0 %vm461_vm0, %v2622_v21  ;;  %v1556_v53 = vrot.slane %v2464_v45, %v2581_v15  ;;  %v1569_v54 = vrot.slane %v1459_v44, %v2581_v15  ;;  %v1809_v56 = vmax.f32 %v1808_v46, 0.0  ;;  %v1548_v57 = vsel %vm1533_vm10, %v1542_v48, 0.0  ;;  %v2372_v46 = vld [vmem:[%s2561_s8 + $0x1] ss:$8 sm:$0x3] }
  0x3e   : > { %936 = vmatprep.mubr.f32.mxu1 %v2500_v0  ;;  %1287 = vmatprep.mubr.f32.mxu0 %v2500_v0  ;;  %v1552_v58 = vrot.slane %v2464_v45, %v2584_v16  ;;  %v1565_v59 = vrot.slane %v1459_v44, %v2584_v16  ;;  %vm1531_vm12 = vcmp.eq.s32.totalorder %v2566_v4, %v1529_v40  ;;  %v1547_v60 = vsel %vm1532_vm11, %v1538_v55, 0.0 }
  0x3f   : > { %vm1560_vm13 = vcmp.eq.s32.totalorder %v2578_v14, %v1556_v53  ;;  %v1546_v61 = vsel %vm1531_vm12, %v1542_v48, 0.0  ;;  %vm1558_vm14 = vcmp.eq.s32.totalorder %v2566_v4, %v1556_v53  ;;  %vm1530_vm1 = vcmp.eq.s32.totalorder %v2566_v4, %v1525_v41 }
  0x40   : > { %v1575_v62 = vsel %vm1560_vm13, %v1569_v54, 0.0  ;;  %vm1559_vm15 = vcmp.eq.s32.totalorder %v2578_v14, %v1552_v58  ;;  %v1573_v50 = vsel %vm1558_vm14, %v1569_v54, 0.0  ;;  %v1545_v3 = vsel %vm1530_vm1, %v1538_v55, 0.0 }
  0x41   : > { %2378 = vmatmul.mubr.msk.f32.gmra.mxu1 %vm461_vm0, %v2691_v1  ;;  %2388 = vmatmul.mubr.msk.f32.gmra.mxu0 %vm461_vm0, %v2650_v37  ;;  %v1579_v63 = vadd.f32 %v1575_v62, %v1548_v57  ;;  %v1574_v2 = vsel %vm1559_vm15, %v1565_v59, 0.0  ;;  %vm1557_vm2 = vcmp.eq.s32.totalorder %v2566_v4, %v1552_v58  ;;  %v1810_v6 = vmin.f32 %v1809_v56, 15.0  ;;  %v2383_v58 = vld [vmem:[%s3342_s2 + $0x2] ss:$8 sm:$0x3] }
  0x42   : > { %942 = vmatprep.mubr.f32.mxu1 %v2500_v0  ;;  %1293 = vmatprep.mubr.f32.mxu0 %v2500_v0  ;;  %v1578_v5 = vadd.f32 %v1574_v2, %v1547_v60  ;;  %v1819_v7 = vsub.f32 %v1807_v49, %v1814_v47  ;;  %v1577_v8 = vadd.f32 %v1573_v50, %v1546_v61  ;;  %v1572_v9 = vsel %vm1557_vm2, %v1565_v59, 0.0  ;;  %v2384_v59 = vld [vmem:[%s2561_s8 + $0x2] ss:$8 sm:$0x3] }
  0x43   : > { %1608 = vmatprep.subr.mxu1 %v1579_v63  ;;  %v2469_v10 = vtrunc.f32 %v1807_v49  ;;  %v1821_v12 = vsub.f32 %v1810_v6, %v1814_v47  ;;  %v2471_v26 = vtrunc.f32 %v1810_v6  ;;  %v1576_v42 = vadd.f32 %v1572_v9, %v1545_v3 }
  0x44   : > { %v1820_v11 = vadd.f32 1.0, %v1819_v7  ;;  %1609 = vmatpush1.msra.mxu1 %v1578_v5  ;;  %v1067_v5 = vadd.f32 %v2384_v59, %v2383_v58 }
  0x45   : > { %2379 = vmatmul.mubr.msk.f32.gmra.mxu1 %vm461_vm0, %v2714_v18  ;;  %2389 = vmatmul.mubr.msk.f32.gmra.mxu0 %vm461_vm0, %v2667_v51  ;;  %v2470_v13 = vcvt.f32.s32 %v2469_v10  ;;  %v1822_v17 = vsub.f32 1.0, %v1821_v12  ;;  %v2472_v19 = vcvt.f32.s32 %v2471_v26 }
  0x46   : > { %948 = vmatprep.mubr.f32.mxu1 %v2500_v0  ;;  %1299 = vmatprep.mubr.f32.mxu0 %v2500_v0  ;;  %v1905_v20 = vrot.slane %v1820_v11, %v2581_v15  ;;  %v1901_v23 = vrot.slane %v1820_v11, %v2584_v16 }
  0x47   : > { %1610 = vmatprep.subr.mxu1 %v1577_v8  ;;  %v1892_v24 = vrot.slane %v2470_v13, %v2581_v15  ;;  %v1888_v25 = vrot.slane %v2470_v13, %v2584_v16  ;;  %v1919_v27 = vrot.slane %v2472_v19, %v2581_v15  ;;  %v1932_v28 = vrot.slane %v1822_v17, %v2581_v15 }
  0x48   : > { %v1915_v29 = vrot.slane %v2472_v19, %v2584_v16  ;;  %v1928_v30 = vrot.slane %v1822_v17, %v2584_v16  ;;  %1611 = vmatpush1.msra.mxu1 %v1576_v42  ;;  %v1073_v13 = vfloor.f32 %v1067_v5  ;;  %v2395_v17 = vld [vmem:[%s3342_s2 + $0x3] ss:$8 sm:$0x3] }
  0x49   : > { %2380 = vmatmul.mubr.msk.f32.gmra.mxu1 %vm461_vm0, %v2625_v22  ;;  %2390 = vmatmul.mubr.msk.f32.gmra.mxu0 %vm461_vm0, %v2691_v1  ;;  %vm1896_vm3 = vcmp.eq.s32.totalorder %v2578_v14, %v1892_v24  ;;  %vm1895_vm4 = vcmp.eq.s32.totalorder %v2578_v14, %v1888_v25  ;;  %vm1923_vm5 = vcmp.eq.s32.totalorder %v2578_v14, %v1919_v27  ;;  %v2396_v19 = vld [vmem:[%s2561_s8 + $0x3] ss:$8 sm:$0x3] }
  0x4a   : > { %954 = vmatprep.mubr.f32.mxu1 %v2500_v0  ;;  %1305 = vmatprep.mubr.f32.mxu0 %v2500_v0  ;;  %v1911_v31 = vsel %vm1896_vm3, %v1905_v20, 0.0  ;;  %v1910_v33 = vsel %vm1895_vm4, %v1901_v23, 0.0  ;;  %vm1922_vm6 = vcmp.eq.s32.totalorder %v2578_v14, %v1915_v29  ;;  %v1938_v32 = vsel %vm1923_vm5, %v1932_v28, 0.0 }
  0x4b   : > { %v1937_v35 = vsel %vm1922_vm6, %v1928_v30, 0.0  ;;  %vm1894_vm7 = vcmp.eq.s32.totalorder %v2566_v4, %v1892_v24  ;;  %vm1921_vm8 = vcmp.eq.s32.totalorder %v2566_v4, %v1919_v27  ;;  %v1942_v36 = vadd.f32 %v1938_v32, %v1911_v31 }
  0x4c   : > { %v1941_v38 = vadd.f32 %v1937_v35, %v1910_v33  ;;  %v1909_v39 = vsel %vm1894_vm7, %v1905_v20, 0.0  ;;  %v1936_v40 = vsel %vm1921_vm8, %v1932_v28, 0.0  ;;  %vm1893_vm9 = vcmp.eq.s32.totalorder %v2566_v4, %v1888_v25 }
  0x4d   : > { %2381 = vmatmul.mubr.msk.f32.gmra.mxu1 %vm461_vm0, %v2653_v34  ;;  %2391 = vmatmul.mubr.msk.f32.gmra.mxu0 %vm461_vm0, %v2714_v18  ;;  %vm1920_vm10 = vcmp.eq.s32.totalorder %v2566_v4, %v1915_v29  ;;  %v1940_v41 = vadd.f32 %v1936_v40, %v1909_v39  ;;  %v1908_v43 = vsel %vm1893_vm9, %v1901_v23, 0.0  ;;  %v1077_v29 = vadd.f32 1.0, %v1073_v13 }
  0x4e   : > { %960 = vmatprep.mubr.f32.mxu1 %v2500_v0  ;;  %1311 = vmatprep.mubr.f32.mxu0 %v2500_v0  ;;  %v1935_v44 = vsel %vm1920_vm10, %v1928_v30, 0.0  ;;  %v2871_v30 = vadd.f32 %v2396_v19, %v2395_v17  ;;  %v1075_v32 = vmax.f32 %v1073_v13, 0.0 }
  0x4f   : > { %1971 = vmatprep.subr.mxu0 %v1942_v36  ;;  %v1939_v45 = vadd.f32 %v1935_v44, %v1908_v43  ;;  %v1078_v43 = vmax.f32 %v1077_v29, 0.0 }
  0x50   : > { %1972 = vmatpush1.msra.mxu0 %v1941_v38  ;;  %v1436_v44 = vfloor.f32 %v2871_v30 }
  0x51   : > { %2382 = vmatmul.mubr.msk.f32.gmra.mxu1 %vm461_vm0, %v2670_v52  ;;  %2392 = vmatmul.mubr.msk.f32.gmra.mxu0 %vm461_vm0, %v2625_v22 }
  0x52   : > { %1317 = vmatprep.mubr.f32.mxu0 %v2500_v0  ;;  %1644 = vmatprep.mubr.f32.mxu1 %v2500_v0 }
  0x53   : > { %1973 = vmatprep.subr.mxu0 %v1940_v41 }
  0x54   : > { %1974 = vmatpush1.msra.mxu0 %v1939_v45 }
  0x55   : > { %2393 = vmatmul.mubr.msk.f32.gmra.mxu0 %vm461_vm0, %v2653_v34  ;;  %2399 = vmatmul.mubr.msk.f32.vlgmr.msra.gmra.mxu1 %vm461_vm0, %v2622_v21 }
  0x56   : > { %1323 = vmatprep.mubr.f32.mxu0 %v2500_v0  ;;  %1650 = vmatprep.mubr.f32.mxu1 %v2500_v0 }
  0x59   : > { %2394 = vmatmul.mubr.msk.f32.gmra.mxu0 %vm461_vm0, %v2670_v52  ;;  %2400 = vmatmul.mubr.msk.f32.gmra.mxu1 %vm461_vm0, %v2650_v37 }
  0x5a   : > { %1656 = vmatprep.mubr.f32.mxu1 %v2500_v0  ;;  %2007 = vmatprep.mubr.f32.mxu0 %v2500_v0 }
  0x5d   : > { %2401 = vmatmul.mubr.msk.f32.gmra.mxu1 %vm461_vm0, %v2667_v51  ;;  %2411 = vmatmul.mubr.msk.f32.vlgmr.msra.gmra.mxu0 %vm461_vm0, %v2622_v21  ;;  %v310_v21 = vld [vmem:[%s3342_s2] ss:$8 sm:$0x3] }
  0x5e   : > { %1662 = vmatprep.mubr.f32.mxu1 %v2500_v0  ;;  %2013 = vmatprep.mubr.f32.mxu0 %v2500_v0 }
  0x61   : > { %2402 = vmatmul.mubr.msk.f32.gmra.mxu1 %vm461_vm0, %v2691_v1  ;;  %2412 = vmatmul.mubr.msk.f32.gmra.mxu0 %vm461_vm0, %v2650_v37  ;;  %v311_v37 = vld [vmem:[%s2561_s8] ss:$8 sm:$0x3] }
  0x62   : > { %1668 = vmatprep.mubr.f32.mxu1 %v2500_v0  ;;  %2019 = vmatprep.mubr.f32.mxu0 %v2500_v0 }
  0x65   : > { %2403 = vmatmul.mubr.msk.f32.gmra.mxu1 %vm461_vm0, %v2714_v18  ;;  %2413 = vmatmul.mubr.msk.f32.gmra.mxu0 %vm461_vm0, %v2667_v51  ;;  %v312_v51 = vadd.f32 %v311_v37, %v310_v21  ;;  %v1076_v37 = vmin.f32 %v1075_v32, 15.0 }
  0x66   : > { %1674 = vmatprep.mubr.f32.mxu1 %v2500_v0  ;;  %2025 = vmatprep.mubr.f32.mxu0 %v2500_v0 }
  0x69   : > { %2404 = vmatmul.mubr.msk.f32.gmra.mxu1 %vm461_vm0, %v2625_v22  ;;  %2414 = vmatmul.mubr.msk.f32.gmra.mxu0 %vm461_vm0, %v2691_v1  ;;  %v317_v1 = vfloor.f32 %v312_v51 }
  0x6a   : > { %1680 = vmatprep.mubr.f32.mxu1 %v2500_v0  ;;  %2031 = vmatprep.mubr.f32.mxu0 %v2500_v0 }
  0x6d   : > { %2405 = vmatmul.mubr.msk.f32.gmra.mxu1 %vm461_vm0, %v2653_v34  ;;  %2415 = vmatmul.mubr.msk.f32.gmra.mxu0 %vm461_vm0, %v2714_v18  ;;  %v2371_v18 = vld [vmem:[%s3342_s2 + $0x1] ss:$8 sm:$0x3] }
  0x6e   : > { %1686 = vmatprep.mubr.f32.mxu1 %v2500_v0  ;;  %2037 = vmatprep.mubr.f32.mxu0 %v2500_v0 }
  0x71   : > { %2406 = vmatmul.mubr.msk.f32.gmra.mxu1 %vm461_vm0, %v2670_v52  ;;  %2416 = vmatmul.mubr.msk.f32.gmra.mxu0 %vm461_vm0, %v2625_v22  ;;  %v321_v22 = vadd.f32 1.0, %v317_v1 }
  0x72   : > { %2043 = vmatprep.mubr.f32.mxu0 %v2500_v0  ;;  %2245 = vmatprep.mubr.f32.mxu1 %v2500_v0 }
  0x73   : > { %v322_v47 = vmax.f32 %v321_v22, 0.0  ;;  %v2407_v22 = vld [vmem:[%s3342_s2 + $0x4] ss:$8 sm:$0x3] }
  0x75   : > { %2417 = vmatmul.mubr.msk.f32.gmra.mxu0 %vm461_vm0, %v2653_v34  ;;  %v319_v34 = vmax.f32 %v317_v1, 0.0  ;;  %v323_v49 = vmin.f32 %v322_v47, 15.0 }
  0x76   : > { %2049 = vmatprep.mubr.f32.mxu0 %v2500_v0  ;;  %v704_v0 = vadd.f32 %v2372_v46, %v2371_v18  ;;  %v2408_v18 = vld [vmem:[%s2561_s8 + $0x4] ss:$8 sm:$0x3] }
  0x77   : > { %v320_v48 = vmin.f32 %v319_v34, 15.0  ;;  %v2435_v56 = vtrunc.f32 %v323_v49 }
  0x78   : > { %v710_v53 = vfloor.f32 %v704_v0  ;;  %v722_v3 = vmax.f32 %v704_v0, 0.0 }
  0x79   : > { %2418 = vmatmul.mubr.msk.f32.gmra.mxu0 %vm461_vm0, %v2670_v52  ;;  %v329_v52 = vmax.f32 %v312_v51, 0.0  ;;  %v2433_v55 = vtrunc.f32 %v320_v48  ;;  %v2436_v50 = vcvt.f32.s32 %v2435_v56  ;;  %v1085_v51 = vmax.f32 %v1067_v5, 0.0 }
  0x7a   : > { %v714_v57 = vadd.f32 1.0, %v710_v53  ;;  %v712_v63 = vmax.f32 %v710_v53, 0.0  ;;  %v723_v42 = vmin.f32 %v722_v3, 15.0  ;;  %v1440_v53 = vadd.f32 1.0, %v1436_v44 }
  0x7b   : > { %v330_v54 = vmin.f32 %v329_v52, 15.0  ;;  %v2434_v62 = vcvt.f32.s32 %v2433_v55  ;;  %v375_v9 = vrot.slane %v2436_v50, %v2584_v16  ;;  %v379_v26 = vrot.slane %v2436_v50, %v2581_v15 }
  0x7c   : > { %v715_v2 = vmax.f32 %v714_v57, 0.0  ;;  %v713_v10 = vmin.f32 %v712_v63, 15.0  ;;  %v1079_v52 = vmin.f32 %v1078_v43, 15.0  ;;  %v2892_v57 = vadd.f32 %v2408_v18, %v2407_v22 }
  0x7d   : > { %v333_v60 = vsub.f32 %v320_v48, %v330_v54  ;;  %v335_v61 = vsub.f32 %v323_v49, %v330_v54  ;;  %v348_v8 = vrot.slane %v2434_v62, %v2584_v16  ;;  %v352_v12 = vrot.slane %v2434_v62, %v2581_v15 }
  0x7e   : > { %v716_v11 = vmin.f32 %v715_v2, 15.0  ;;  %vm380_vm11 = vcmp.eq.s32.totalorder %v2566_v4, %v375_v9  ;;  %v2441_v27 = vtrunc.f32 %v713_v10  ;;  %vm381_vm13 = vcmp.eq.s32.totalorder %v2566_v4, %v379_v26 }
  0x7f   : > { %v334_v6 = vadd.f32 1.0, %v333_v60  ;;  %v336_v7 = vsub.f32 1.0, %v335_v61  ;;  %vm353_vm0 = vcmp.eq.s32.totalorder %v2566_v4, %v348_v8  ;;  %vm354_vm12 = vcmp.eq.s32.totalorder %v2566_v4, %v352_v12 }
  0x80   : > { %v2443_v28 = vtrunc.f32 %v716_v11  ;;  %v726_v31 = vsub.f32 %v713_v10, %v723_v42  ;;  %v728_v33 = vsub.f32 %v716_v11, %v723_v42  ;;  %v2442_v40 = vcvt.f32.s32 %v2441_v27 }
  0x81   : > { %v361_v20 = vrot.slane %v334_v6, %v2584_v16  ;;  %v388_v23 = vrot.slane %v336_v7, %v2584_v16  ;;  %v365_v24 = vrot.slane %v334_v6, %v2581_v15  ;;  %v392_v25 = vrot.slane %v336_v7, %v2581_v15 }
  0x82   : > { %v2444_v41 = vcvt.f32.s32 %v2443_v28  ;;  %vm355_vm14 = vcmp.eq.s32.totalorder %v2578_v14, %v348_v8  ;;  %vm382_vm15 = vcmp.eq.s32.totalorder %v2578_v14, %v375_v9  ;;  %v727_v45 = vadd.f32 1.0, %v726_v31 }
  0x83   : > { %v368_v35 = vsel %vm353_vm0, %v361_v20, 0.0  ;;  %v395_v36 = vsel %vm380_vm11, %v388_v23, 0.0  ;;  %v369_v38 = vsel %vm354_vm12, %v365_v24, 0.0  ;;  %v396_v39 = vsel %vm381_vm13, %v392_v25, 0.0 }
  0x84   : > { %v729_v21 = vsub.f32 1.0, %v728_v33  ;;  %v2876_v1 = vadd.f32 %v395_v36, %v368_v35  ;;  %vm356_vm1 = vcmp.eq.s32.totalorder %v2578_v14, %v352_v12  ;;  %vm383_vm2 = vcmp.eq.s32.totalorder %v2578_v14, %v379_v26 }
  0x85   : > { %v370_v46 = vsel %vm355_vm14, %v361_v20, 0.0  ;;  %v2884_v34 = vadd.f32 %v396_v39, %v369_v38  ;;  %v741_v47 = vrot.slane %v2442_v40, %v2584_v16  ;;  %v768_v0 = vrot.slane %v2444_v41, %v2584_v16 }
  0x86   : > { %v397_v48 = vsel %vm382_vm15, %v388_v23, 0.0  ;;  %v745_v49 = vrot.slane %v2442_v40, %v2581_v15  ;;  %v371_v54 = vsel %vm356_vm1, %v365_v24, 0.0  ;;  %v398_v55 = vsel %vm383_vm2, %v392_v25, 0.0 }
  0x87   : > { %v772_v56 = vrot.slane %v2444_v41, %v2581_v15  ;;  %v754_v58 = vrot.slane %v727_v45, %v2584_v16  ;;  %v781_v59 = vrot.slane %v729_v21, %v2584_v16  ;;  %v1086_v60 = vmin.f32 %v1085_v51, 15.0 }
  0x88   : > { %v2449_v61 = vtrunc.f32 %v1076_v37  ;;  %vm746_vm3 = vcmp.eq.s32.totalorder %v2566_v4, %v741_v47  ;;  %vm773_vm4 = vcmp.eq.s32.totalorder %v2566_v4, %v768_v0  ;;  %v758_v62 = vrot.slane %v727_v45, %v2581_v15 }
  0x89   : > { %v785_v50 = vrot.slane %v729_v21, %v2581_v15  ;;  %vm747_vm5 = vcmp.eq.s32.totalorder %v2566_v4, %v745_v49  ;;  %v2451_v63 = vtrunc.f32 %v1079_v52  ;;  %v1438_v2 = vmax.f32 %v1436_v44, 0.0 }
  0x8a   : > { %v1441_v3 = vmax.f32 %v1440_v53, 0.0  ;;  %v2901_v5 = vadd.f32 %v397_v48, %v370_v46  ;;  %v2903_v6 = vadd.f32 %v398_v55, %v371_v54  ;;  %vm774_vm6 = vcmp.eq.s32.totalorder %v2566_v4, %v772_v56 }
  0x8b   : > { %v1799_v7 = vfloor.f32 %v2892_v57  ;;  %v761_v8 = vsel %vm746_vm3, %v754_v58, 0.0  ;;  %v1089_v9 = vsub.f32 %v1076_v37, %v1086_v60  ;;  %v1091_v10 = vsub.f32 %v1079_v52, %v1086_v60 }
  0x8c   : > { %v2450_v11 = vcvt.f32.s32 %v2449_v61  ;;  %v788_v12 = vsel %vm773_vm4, %v781_v59, 0.0  ;;  %v762_v26 = vsel %vm747_vm5, %v758_v62, 0.0  ;;  %vm748_vm7 = vcmp.eq.s32.totalorder %v2578_v14, %v741_v47 }
  0x8d   : > { %v1448_v42 = vmax.f32 %v2871_v30, 0.0  ;;  %v789_v13 = vsel %vm774_vm6, %v785_v50, 0.0  ;;  %v2452_v17 = vcvt.f32.s32 %v2451_v63  ;;  %v1439_v19 = vmin.f32 %v1438_v2, 15.0 }
  0x8e   : > { %v1442_v20 = vmin.f32 %v1441_v3, 15.0  ;;  %vm775_vm8 = vcmp.eq.s32.totalorder %v2578_v14, %v768_v0  ;;  %vm749_vm9 = vcmp.eq.s32.totalorder %v2578_v14, %v745_v49  ;;  %vm776_vm10 = vcmp.eq.s32.totalorder %v2578_v14, %v772_v56 }
  0x8f   : > { %v1803_v23 = vadd.f32 1.0, %v1799_v7  ;;  %v1090_v24 = vadd.f32 1.0, %v1089_v9  ;;  %v1092_v25 = vsub.f32 1.0, %v1091_v10  ;;  %v1104_v27 = vrot.slane %v2450_v11, %v2584_v16 }
  0x90   : > { %v1108_v28 = vrot.slane %v2450_v11, %v2581_v15  ;;  %v2914_v29 = vadd.f32 %v788_v12, %v761_v8  ;;  %v2916_v30 = vadd.f32 %v789_v13, %v762_v26  ;;  %v763_v31 = vsel %vm748_vm7, %v754_v58, 0.0 }
  0x91   : > { %v1449_v33 = vmin.f32 %v1448_v42, 15.0  ;;  %v790_v32 = vsel %vm775_vm8, %v781_v59, 0.0  ;;  %v1131_v35 = vrot.slane %v2452_v17, %v2584_v16  ;;  %v2457_v36 = vtrunc.f32 %v1439_v19 }
  0x92   : > { %v2459_v38 = vtrunc.f32 %v1442_v20  ;;  %v764_v39 = vsel %vm749_vm9, %v758_v62, 0.0  ;;  %v791_v40 = vsel %vm776_vm10, %v785_v50, 0.0  ;;  %v1801_v41 = vmax.f32 %v1799_v7, 0.0 }
  0x93   : > { %v1804_v43 = vmax.f32 %v1803_v23, 0.0  ;;  %vm1109_vm0 = vcmp.eq.s32.totalorder %v2566_v4, %v1104_v27  ;;  %v1117_v44 = vrot.slane %v1090_v24, %v2584_v16  ;;  %v1144_v45 = vrot.slane %v1092_v25, %v2584_v16 }
  0x94   : > { %vm1110_vm11 = vcmp.eq.s32.totalorder %v2566_v4, %v1108_v28  ;;  %v1121_v21 = vrot.slane %v1090_v24, %v2581_v15  ;;  %v1135_v37 = vrot.slane %v2452_v17, %v2581_v15  ;;  %v1452_v51 = vsub.f32 %v1439_v19, %v1449_v33 }
  0x95   : > { %v1454_v22 = vsub.f32 %v1442_v20, %v1449_v33  ;;  %vm1136_vm12 = vcmp.eq.s32.totalorder %v2566_v4, %v1131_v35  ;;  %v2458_v18 = vcvt.f32.s32 %v2457_v36  ;;  %v2460_v46 = vcvt.f32.s32 %v2459_v38 }
  0x96   : > { %v1811_v47 = vmax.f32 %v2892_v57, 0.0  ;;  %v2929_v0 = vadd.f32 %v790_v32, %v763_v31  ;;  %v2931_v48 = vadd.f32 %v791_v40, %v764_v39  ;;  %v1802_v49 = vmin.f32 %v1801_v41, 15.0 }
  0x97   : > { %v1805_v52 = vmin.f32 %v1804_v43, 15.0  ;;  %v1124_v53 = vsel %vm1109_vm0, %v1117_v44, 0.0  ;;  %v1148_v54 = vrot.slane %v1092_v25, %v2581_v15  ;;  %vm1111_vm13 = vcmp.eq.s32.totalorder %v2578_v14, %v1104_v27 }
  0x98   : > { %vm1112_vm14 = vcmp.eq.s32.totalorder %v2578_v14, %v1108_v28  ;;  %v1151_v55 = vsel %vm1136_vm12, %v1144_v45, 0.0  ;;  %v1125_v56 = vsel %vm1110_vm11, %v1121_v21, 0.0  ;;  %v1453_v57 = vadd.f32 1.0, %v1452_v51  ;;  %v2252_v28 = vld [vmem:[%s3345_s5] sm:$0xff] }
  0x99   : > { %v1455_v58 = vsub.f32 1.0, %v1454_v22  ;;  %vm1137_vm15 = vcmp.eq.s32.totalorder %v2566_v4, %v1135_v37  ;;  %v1467_v59 = vrot.slane %v2458_v18, %v2584_v16  ;;  %v1494_v60 = vrot.slane %v2460_v46, %v2584_v16  ;;  %v2260_v22 = vld [vmem:[%s3346_s6] sm:$0xff] }
  0x9a   : > { %v1812_v61 = vmin.f32 %v1811_v47, 15.0  ;;  %v1126_v62 = vsel %vm1111_vm13, %v1117_v44, 0.0  ;;  %vm1138_vm1 = vcmp.eq.s32.totalorder %v2578_v14, %v1131_v35  ;;  %v2465_v50 = vtrunc.f32 %v1802_v49 }
  0x9b   : > { %v2467_v63 = vtrunc.f32 %v1805_v52  ;;  %v2944_v2 = vadd.f32 %v1151_v55, %v1124_v53  ;;  %v1127_v3 = vsel %vm1112_vm14, %v1121_v21, 0.0  ;;  %v1471_v7 = vrot.slane %v2458_v18, %v2581_v15 }
  0x9c   : > { %v1498_v8 = vrot.slane %v2460_v46, %v2581_v15  ;;  %v1152_v9 = vsel %vm1137_vm15, %v1148_v54, 0.0  ;;  %vm1139_vm2 = vcmp.eq.s32.totalorder %v2578_v14, %v1135_v37  ;;  %v1480_v10 = vrot.slane %v1453_v57, %v2584_v16 }
  0x9d   : > { %v1507_v11 = vrot.slane %v1455_v58, %v2584_v16  ;;  %vm1472_vm3 = vcmp.eq.s32.totalorder %v2566_v4, %v1467_v59  ;;  %vm1499_vm4 = vcmp.eq.s32.totalorder %v2566_v4, %v1494_v60  ;;  %v1815_v12 = vsub.f32 %v1802_v49, %v1812_v61 }
  0x9e   : > { %v1817_v26 = vsub.f32 %v1805_v52, %v1812_v61  ;;  %v1484_v42 = vrot.slane %v1453_v57, %v2581_v15  ;;  %v1511_v13 = vrot.slane %v1455_v58, %v2581_v15  ;;  %v2466_v17 = vcvt.f32.s32 %v2465_v50 }
  0x9f   : > { %v2468_v19 = vcvt.f32.s32 %v2467_v63  ;;  %v2955_v20 = vadd.f32 %v1152_v9, %v1125_v56  ;;  %v1153_v23 = vsel %vm1138_vm1, %v1144_v45, 0.0  ;;  %vm1473_vm5 = vcmp.eq.s32.totalorder %v2566_v4, %v1471_v7 }
  0xa0   : > { %vm1500_vm6 = vcmp.eq.s32.totalorder %v2566_v4, %v1498_v8  ;;  %v1154_v24 = vsel %vm1139_vm2, %v1148_v54, 0.0  ;;  %v1487_v25 = vsel %vm1472_vm3, %v1480_v10, 0.0  ;;  %v1514_v27 = vsel %vm1499_vm4, %v1507_v11, 0.0 }
  0xa1   : > { %vm1474_vm7 = vcmp.eq.s32.totalorder %v2578_v14, %v1467_v59  ;;  %vm1501_vm8 = vcmp.eq.s32.totalorder %v2578_v14, %v1494_v60  ;;  %v1816_v32 = vadd.f32 1.0, %v1815_v12  ;;  %v1818_v35 = vsub.f32 1.0, %v1817_v26 }
  0xa2   : > { %v2501_v36 = vmov 0   ;;  %v1488_v38 = vsel %vm1473_vm5, %v1484_v42, 0.0  ;;  %v1515_v39 = vsel %vm1500_vm6, %v1511_v13, 0.0  ;;  %v2969_v40 = vrot.slane %v2466_v17, %v2584_v16 }
  0xa3   : > { %2483 = vset.pattern.permute.xlu0 %v2501_v36  ;;  %v2972_v41 = vrot.slane %v2468_v19, %v2584_v16  ;;  %v2976_v45 = vadd.f32 %v1153_v23, %v1126_v62  ;;  %v2978_v21 = vadd.f32 %v1154_v24, %v1127_v3  ;;  %v2980_v37 = vadd.f32 %v1514_v27, %v1487_v25 }
  0xa4   : > { %2255 = vperm.xlu0 %2483, %v2252_v28   ;;  %v2983_v51 = vrot.slane %v2466_v17, %v2581_v15  ;;  %v1489_v18 = vsel %vm1474_vm7, %v1480_v10, 0.0  ;;  %v1516_v46 = vsel %vm1501_vm8, %v1507_v11, 0.0  ;;  %vm1475_vm9 = vcmp.eq.s32.totalorder %v2578_v14, %v1471_v7 }
  0xa5   : > { %vm1502_vm10 = vcmp.eq.s32.totalorder %v2578_v14, %v1498_v8  ;;  %v2994_v52 = vadd.f32 %v1515_v39, %v1488_v38  ;;  %v1843_v53 = vrot.slane %v1816_v32, %v2584_v16  ;;  %v1870_v54 = vrot.slane %v1818_v35, %v2584_v16 }
  0xa6   : > { %v2999_v55 = vrot.slane %v2468_v19, %v2581_v15  ;;  %vm1835_vm0 = vcmp.eq.s32.totalorder %v2566_v4, %v2969_v40  ;;  %vm1862_vm11 = vcmp.eq.s32.totalorder %v2566_v4, %v2972_v41  ;;  %v3007_v60 = vadd.f32 %v1516_v46, %v1489_v18 }
  0xa7   : > { %v1490_v16 = vsel %vm1475_vm9, %v1484_v42, 0.0  ;;  %v1517_v61 = vsel %vm1502_vm10, %v1511_v13, 0.0  ;;  %vm1836_vm12 = vcmp.eq.s32.totalorder %v2566_v4, %v2983_v51  ;;  %v1850_v11 = vsel %vm1835_vm0, %v1843_v53, 0.0 }
  0xa8   : > { %2263 = vperm.xlu0 %2483, %v2260_v22   ;;  %v1877_v12 = vsel %vm1862_vm11, %v1870_v54, 0.0  ;;  %v1847_v7 = vrot.slane %v1816_v32, %v2581_v15  ;;  %v1874_v26 = vrot.slane %v1818_v35, %v2581_v15  ;;  %vm1863_vm13 = vcmp.eq.s32.totalorder %v2566_v4, %v2999_v55 }
  0xa9   : > { %v3024_v24 = vadd.f32 %v1517_v61, %v1490_v16  ;;  %vm1837_vm14 = vcmp.eq.s32.totalorder %v2578_v14, %v2969_v40  ;;  %vm1864_vm15 = vcmp.eq.s32.totalorder %v2578_v14, %v2972_v41  ;;  %v3030_v28 = vadd.f32 %v1877_v12, %v1850_v11 }
  0xaa   : > { %v1851_v36 = vsel %vm1836_vm12, %v1847_v7, 0.0  ;;  %v1878_v38 = vsel %vm1863_vm13, %v1874_v26, 0.0  ;;  %vm1838_vm1 = vcmp.eq.s32.totalorder %v2578_v14, %v2983_v51  ;;  %v1879_v4 = vsel %vm1864_vm15, %v1870_v54, 0.0 }
  0xab   : > { %vm1865_vm2 = vcmp.eq.s32.totalorder %v2578_v14, %v2999_v55  ;;  %v1853_v40 = vsel %vm1838_vm1, %v1847_v7, 0.0  ;;  %vm684_vm3 = vcmask 1041409   ;;  %vm686_vm4 = vcmask 1045509  }
  0xac   : > { %v1880_v51 = vsel %vm1865_vm2, %v1874_v26, 0.0  ;;  %vm689_vm5 = vcmask 1042434   ;;  %vm691_vm6 = vcmask 1046534   ;;  %vm694_vm7 = vcmask 1043459  }
  0xad   : > { %vm696_vm8 = vcmask 1047559   ;;  %vm2176_vm9 = vcmask 1043456   ;;  %vm2172_vm10 = vcmask 162816  }
  0xe9   : > { %v552_v31 = vpop.f32.mrf.mxu0  ;;  %v2964_v33 = vpop.f32.mrf.mxu1 }
  0xea   : > { %v599_v56 = vmul.f32 %v552_v31, %v2876_v1  ;;  %v609_v41 = vmul.f32 %v2964_v33, %v2901_v5 }
  0xeb   : > { %v554_v43 = vpop.f32.mrf.mxu0  ;;  %v2974_v44 = vpop.f32.mrf.mxu1 }
  0xec   : > { %v600_v62 = vmul.f32 %v554_v43, %v2884_v34 }
  0xed   : > { %v558_v47 = vpop.f32.mrf.mxu0  ;;  %v588_v49 = vpop.f32.mrf.mxu1 }
  0xee   : > { %v601_v57 = vmul.f32 %v558_v47, %v2901_v5  ;;  %v611_v63 = vmul.f32 %v588_v49, %v2876_v1 }
  0xef   : > { %v560_v58 = vpop.f32.mrf.mxu0  ;;  %v590_v59 = vpop.f32.mrf.mxu1 }
  0xf0   : > { %v615_v50 = vadd.f32 %v601_v57, %v599_v56  ;;  %v602_v3 = vmul.f32 %v560_v58, %v2903_v6  ;;  %v612_v17 = vmul.f32 %v590_v59, %v2884_v34  ;;  %v1852_v57 = vsel %vm1837_vm14, %v1843_v53, 0.0 }
  0xf1   : > { %v564_v9 = vpop.f32.mrf.mxu0  ;;  %v594_v10 = vpop.f32.mrf.mxu1 }
  0xf2   : > { %v616_v8 = vrot.slane %v615_v50, 4  ;;  %v622_v42 = vadd.f32 %v602_v3, %v600_v62  ;;  %v613_v13 = vmul.f32 %v594_v10, %v2901_v5  ;;  %v603_v22 = vmul.f32 %v564_v9, %v2876_v1 }
  0xf3   : > { %v566_v19 = vpop.f32.mrf.mxu0  ;;  %v596_v23 = vpop.f32.mrf.mxu1 }
  0xf4   : > { %v617_v15 = vadd.f32 %v616_v8, %v615_v50  ;;  %v623_v25 = vrot.slane %v622_v42, 4  ;;  %v657_v27 = vadd.f32 %v613_v13, %v611_v63  ;;  %v614_v31 = vmul.f32 %v596_v23, %v2903_v6 }
  0xf5   : > { %v570_v32 = vpop.f32.mrf.mxu0  ;;  %v920_v35 = vpop.f32.mrf.mxu1  ;;  %v604_v61 = vmul.f32 %v566_v19, %v2884_v34 }
  0xf6   : > { %v618_v39 = vrot.slane %v617_v15, 2  ;;  %v624_v43 = vadd.f32 %v623_v25, %v622_v42  ;;  %v605_v18 = vmul.f32 %v570_v32, %v2901_v5  ;;  %v658_v46 = vrot.slane %v657_v27, 4 }
  0xf7   : > { %v664_v47 = vadd.f32 %v614_v31, %v612_v17  ;;  %v572_v49 = vpop.f32.mrf.mxu0  ;;  %v922_v56 = vpop.f32.mrf.mxu1  ;;  %v967_v62 = vmul.f32 %v920_v35, %v2914_v29  ;;  %v610_v5 = vmul.f32 %v2974_v44, %v2903_v6 }
  0xf8   : > { %v619_v58 = vadd.f32 %v618_v39, %v617_v15  ;;  %v625_v59 = vrot.slane %v624_v43, 2  ;;  %v629_v16 = vadd.f32 %v605_v18, %v603_v22  ;;  %v606_v50 = vmul.f32 %v572_v49, %v2903_v6 }
  0xf9   : > { %v576_v63 = vpop.f32.mrf.mxu0  ;;  %v926_v3 = vpop.f32.mrf.mxu1  ;;  %v659_v10 = vadd.f32 %v658_v46, %v657_v27  ;;  %v665_v19 = vrot.slane %v664_v47, 4  ;;  %v968_v14 = vmul.f32 %v922_v56, %v2916_v30 }
  0xfa   : > { %v620_v53 = vrot.slane %v619_v58, 1  ;;  %v626_v54 = vadd.f32 %v625_v59, %v624_v43  ;;  %v630_v9 = vrot.slane %v629_v16, 4  ;;  %v636_v11 = vadd.f32 %v606_v50, %v604_v61 }
  0xfb   : > { %v607_v12 = vmul.f32 %v576_v63, %v2876_v1  ;;  %v969_v8 = vmul.f32 %v926_v3, %v2929_v0  ;;  %v578_v42 = vpop.f32.mrf.mxu0  ;;  %v928_v13 = vpop.f32.mrf.mxu1  ;;  %v660_v39 = vrot.slane %v659_v10, 2  ;;  %v3071_v44 = vadd.f32 %v665_v19, %v664_v47 }
  0xfc   : > { %v627_v17 = vrot.slane %v626_v54, 1  ;;  %v631_v23 = vadd.f32 %v630_v9, %v629_v16  ;;  %v637_v33 = vrot.slane %v636_v11, 4  ;;  %v3063_v1 = vadd.f32 %v620_v53, %v619_v58 }
  0xfd   : > { %v643_v7 = vadd.f32 %v609_v41, %v607_v12  ;;  %v983_v15 = vadd.f32 %v969_v8, %v967_v62  ;;  %v932_v25 = vpop.f32.mrf.mxu1  ;;  %v1283_v27 = vpop.f32.mrf.mxu0  ;;  %v608_v35 = vmul.f32 %v578_v42, %v2884_v34  ;;  %v3073_v34 = vadd.f32 %v1878_v38, %v1851_v36 }
  0xfe   : > { %v3065_v31 = vadd.f32 %v627_v17, %v626_v54  ;;  %v632_v32 = vrot.slane %v631_v23, 2  ;;  %v638_v43 = vadd.f32 %v637_v33, %v636_v11  ;;  %v970_v50 = vmul.f32 %v928_v13, %v2931_v48 }
  0xff   : > { %v644_v55 = vrot.slane %v643_v7, 4  ;;  %v934_v26 = vpop.f32.mrf.mxu1  ;;  %v1285_v22 = vpop.f32.mrf.mxu0  ;;  %v650_v46 = vadd.f32 %v610_v5, %v608_v35  ;;  %v984_v59 = vrot.slane %v983_v15, 4  ;;  %v3076_v63 = vadd.f32 %v1879_v4, %v1852_v57 }
 0x100   : > { %v679_v6 = vcombine.low %v3063_v1, %v3065_v31  ;;  %v633_v18 = vadd.f32 %v632_v32, %v631_v23  ;;  %v639_v49 = vrot.slane %v638_v43, 2  ;;  %v661_v3 = vadd.f32 %v660_v39, %v659_v10 }
 0x101   : > { %v645_v58 = vadd.f32 %v644_v55, %v643_v7  ;;  %v938_v16 = vpop.f32.mrf.mxu1  ;;  %v1289_v61 = vpop.f32.mrf.mxu0  ;;  %v651_v56 = vrot.slane %v650_v46, 4  ;;  %v3078_v9 = vadd.f32 %v1880_v51, %v1853_v40  ;;  %v667_v11 = vrot.slane %v3071_v44, 2 }
 0x102   : > { %v634_v62 = vrot.slane %v633_v18, 1  ;;  %v640_v41 = vadd.f32 %v639_v49, %v638_v43  ;;  %v990_v8 = vadd.f32 %v970_v50, %v968_v14  ;;  %v971_v36 = vmul.f32 %v932_v25, %v2914_v29 }
 0x103   : > { %v646_v47 = vrot.slane %v645_v58, 2  ;;  %v940_v53 = vpop.f32.mrf.mxu1  ;;  %v1291_v54 = vpop.f32.mrf.mxu0  ;;  %v652_v12 = vadd.f32 %v651_v56, %v650_v46  ;;  %v985_v19 = vadd.f32 %v984_v59, %v983_v15  ;;  %v972_v23 = vmul.f32 %v934_v26, %v2916_v30 }
 0x104   : > { %v635_v38 = vadd.f32 %v634_v62, %v633_v18  ;;  %v641_v42 = vrot.slane %v640_v41, 1  ;;  %v991_v10 = vrot.slane %v990_v8, 4  ;;  %v973_v5 = vmul.f32 %v938_v16, %v2929_v0 }
 0x105   : > { %v647_v17 = vadd.f32 %v646_v47, %v645_v58  ;;  %v944_v13 = vpop.f32.mrf.mxu1  ;;  %v1295_v57 = vpop.f32.mrf.mxu0  ;;  %v653_v4 = vrot.slane %v652_v12, 2  ;;  %v1330_v33 = vmul.f32 %v1283_v27, %v2944_v2  ;;  %v1332_v7 = vmul.f32 %v1289_v61, %v2976_v45 }
 0x106   : > { %v642_v40 = vadd.f32 %v641_v42, %v640_v41  ;;  %v992_v39 = vadd.f32 %v991_v10, %v990_v8  ;;  %v997_v43 = vadd.f32 %v973_v5, %v971_v36  ;;  %v974_v15 = vmul.f32 %v940_v53, %v2931_v48 }
 0x107   : > { %v648_v51 = vrot.slane %v647_v17, 1  ;;  %v946_v32 = vpop.f32.mrf.mxu1  ;;  %v1297_v25 = vpop.f32.mrf.mxu0  ;;  %v654_v35 = vadd.f32 %v653_v4, %v652_v12  ;;  %v662_v14 = vrot.slane %v661_v3, 1  ;;  %v986_v18 = vrot.slane %v985_v19, 2 }
 0x108   : > { %v680_v55 = vcombine.low %v635_v38, %v642_v40  ;;  %v1346_v46 = vadd.f32 %v1332_v7, %v1330_v33  ;;  %v1331_v59 = vmul.f32 %v1285_v22, %v2955_v20  ;;  %v998_v16 = vrot.slane %v997_v43, 4 }
 0x109   : > { %v950_v26 = vpop.f32.mrf.mxu1  ;;  %v1301_v49 = vpop.f32.mrf.mxu0  ;;  %v655_v58 = vrot.slane %v654_v35, 1  ;;  %v1004_v27 = vadd.f32 %v974_v15, %v972_v23  ;;  %v993_v61 = vrot.slane %v992_v39, 2  ;;  %v1333_v50 = vmul.f32 %v1291_v54, %v2978_v21 }
 0x10a   : > { %v3088_v62 = vrot.slane %v680_v55, 7  ;;  %v1347_v56 = vrot.slane %v1346_v46, 4  ;;  %v3091_v53 = vadd.f32 %v648_v51, %v647_v17  ;;  %v999_v8 = vadd.f32 %v998_v16, %v997_v43 }
 0x10b   : > { %v952_v41 = vpop.f32.mrf.mxu1  ;;  %v1303_v47 = vpop.f32.mrf.mxu0  ;;  %v3093_v12 = vadd.f32 %v655_v58, %v654_v35  ;;  %v1005_v36 = vrot.slane %v1004_v27, 4  ;;  %v668_v38 = vadd.f32 %v667_v11, %v3071_v44  ;;  %v1353_v4 = vadd.f32 %v1333_v50, %v1331_v59 }
 0x10c   : > { %v3101_v22 = vsel %vm684_vm3, %v3088_v62, %v679_v6  ;;  %v1348_v42 = vadd.f32 %v1347_v56, %v1346_v46  ;;  %v987_v17 = vadd.f32 %v986_v18, %v985_v19  ;;  %v1000_v5 = vrot.slane %v999_v8, 2 }
 0x10d   : > { %v956_v54 = vpop.f32.mrf.mxu1  ;;  %v3103_v10 = vpop.f32.mrf.mxu0  ;;  %v1006_v40 = vadd.f32 %v1005_v36, %v1004_v27  ;;  %v3107_v51 = vadd.f32 %v662_v14, %v661_v3  ;;  %v994_v44 = vadd.f32 %v993_v61, %v992_v39  ;;  %v1354_v11 = vrot.slane %v1353_v4, 4 }
 0x10e   : > { %v975_v1 = vmul.f32 %v944_v13, %v2914_v29  ;;  %v1349_v33 = vrot.slane %v1348_v42, 2  ;;  %v1334_v35 = vmul.f32 %v1295_v57, %v2944_v2  ;;  %v976_v19 = vmul.f32 %v946_v32, %v2916_v30 }
 0x10f   : > { %v958_v31 = vpop.f32.mrf.mxu1  ;;  %v3110_v6 = vpop.f32.mrf.mxu0  ;;  %v1007_v7 = vrot.slane %v1006_v40, 2  ;;  %v1001_v43 = vadd.f32 %v1000_v5, %v999_v8  ;;  %v1355_v15 = vadd.f32 %v1354_v11, %v1353_v4  ;;  %v977_v55 = vmul.f32 %v950_v26, %v2929_v0 }
 0x110   : > { %v1336_v3 = vmul.f32 %v1301_v49, %v2976_v45  ;;  %v669_v18 = vrot.slane %v668_v38, 1  ;;  %v988_v46 = vrot.slane %v987_v17, 1  ;;  %v978_v58 = vmul.f32 %v952_v41, %v2931_v48 }
 0x111   : > { %v962_v14 = vpop.f32.mrf.mxu1  ;;  %v1313_v39 = vpop.f32.mrf.mxu0  ;;  %v1008_v13 = vadd.f32 %v1007_v7, %v1006_v40  ;;  %v995_v59 = vrot.slane %v994_v44, 1  ;;  %v1356_v16 = vrot.slane %v1355_v15, 2  ;;  %v1011_v27 = vadd.f32 %v977_v55, %v975_v1 }
 0x112   : > { %v1360_v61 = vadd.f32 %v1336_v3, %v1334_v35  ;;  %v3117_v32 = vadd.f32 %v1349_v33, %v1348_v42  ;;  %v1335_v50 = vmul.f32 %v1297_v25, %v2955_v20  ;;  %v1018_v26 = vadd.f32 %v978_v58, %v976_v19 }
 0x113   : > { %v964_v57 = vpop.f32.mrf.mxu1  ;;  %v1315_v56 = vpop.f32.mrf.mxu0  ;;  %v1337_v49 = vmul.f32 %v1303_v47, %v2978_v21  ;;  %v1002_v8 = vrot.slane %v1001_v43, 1  ;;  %v1009_v36 = vrot.slane %v1008_v13, 1  ;;  %v1012_v4 = vrot.slane %v1011_v27, 4 }
 0x114   : > { %v1361_v5 = vrot.slane %v1360_v61, 4  ;;  %v3125_v11 = vadd.f32 %v669_v18, %v668_v38  ;;  %v1357_v1 = vadd.f32 %v1356_v16, %v1355_v15  ;;  %v1019_v7 = vrot.slane %v1018_v26, 4 }
 0x115   : > { %v3121_v40 = vpop.f32.mrf.mxu0  ;;  %v3123_v41 = vpop.f32.mrf.mxu1  ;;  %v1367_v35 = vadd.f32 %v1337_v49, %v1335_v50  ;;  %v3127_v42 = vadd.f32 %v988_v46, %v987_v17  ;;  %v3129_v33 = vadd.f32 %v995_v59, %v994_v44  ;;  %v1013_v25 = vadd.f32 %v1012_v4, %v1011_v27 }
 0x116   : > { %v1362_v19 = vadd.f32 %v1361_v5, %v1360_v61  ;;  %v1351_v3 = vrot.slane %v3117_v32, 1  ;;  %v1020_v58 = vadd.f32 %v1019_v7, %v1018_v26  ;;  %v979_v38 = vmul.f32 %v956_v54, %v2914_v29 }
 0x117   : > { %v3131_v47 = vpop.f32.mrf.mxu0  ;;  %v3133_v55 = vpop.f32.mrf.mxu1  ;;  %v1368_v23 = vrot.slane %v1367_v35, 4  ;;  %v1003_v18 = vadd.f32 %v1002_v8, %v1001_v43  ;;  %v1010_v15 = vadd.f32 %v1009_v36, %v1008_v13  ;;  %v1014_v16 = vrot.slane %v1013_v25, 2 }
 0x118   : > { %v1363_v50 = vrot.slane %v1362_v19, 2  ;;  %v1358_v44 = vrot.slane %v1357_v1, 1  ;;  %v1021_v59 = vrot.slane %v1020_v58, 2  ;;  %v981_v61 = vmul.f32 %v962_v14, %v2929_v0 }
 0x119   : > { %v1325_v17 = vpop.f32.mrf.mxu0  ;;  %v1652_v46 = vpop.f32.mrf.mxu1  ;;  %v1369_v27 = vadd.f32 %v1368_v23, %v1367_v35  ;;  %v1015_v49 = vadd.f32 %v1014_v16, %v1013_v25  ;;  %v1338_v4 = vmul.f32 %v3103_v10, %v2944_v2  ;;  %v980_v26 = vmul.f32 %v958_v31, %v2916_v30 }
 0x11a   : > { %v1340_v5 = vmul.f32 %v1313_v39, %v2976_v45  ;;  %v1364_v43 = vadd.f32 %v1363_v50, %v1362_v19  ;;  %v1022_v13 = vadd.f32 %v1021_v59, %v1020_v58  ;;  %v1025_v36 = vadd.f32 %v981_v61, %v979_v38 }
 0x11b   : > { %v1327_v29 = vpop.f32.mrf.mxu0  ;;  %v3142_v54 = vpop.f32.mrf.mxu1  ;;  %v1370_v8 = vrot.slane %v1369_v27, 2  ;;  %v1048_v7 = vcombine.low %v1003_v18, %v1010_v15  ;;  %v1339_v23 = vmul.f32 %v3110_v6, %v2955_v20  ;;  %v982_v14 = vmul.f32 %v964_v57, %v2931_v48 }
 0x11c   : > { %v1374_v0 = vadd.f32 %v1340_v5, %v1338_v4  ;;  %v1023_v30 = vrot.slane %v1022_v13, 1  ;;  %v1026_v39 = vrot.slane %v1025_v36, 4  ;;  %v1341_v25 = vmul.f32 %v1315_v56, %v2978_v21 }
 0x11d   : > { %v3147_v35 = vpop.f32.mrf.mxu1  ;;  %v3149_v10 = vpop.f32.mrf.mxu0  ;;  %v1371_v31 = vadd.f32 %v1370_v8, %v1369_v27  ;;  %v3349_v19 = vcombine.low %v3091_v53, %v3093_v12  ;;  %v1016_v38 = vrot.slane %v1015_v49, 1  ;;  %v1032_v6 = vadd.f32 %v982_v14, %v980_v26 }
 0x11e   : > { %v1375_v18 = vrot.slane %v1374_v0, 4  ;;  %v1365_v57 = vrot.slane %v1364_v43, 1  ;;  %v1027_v50 = vadd.f32 %v1026_v39, %v1025_v36  ;;  %v1381_v59 = vadd.f32 %v1341_v25, %v1339_v23 }
 0x11f   : > { %v3155_v58 = vrot.slane %v3349_v19, 6  ;;  %v3157_v15 = vpop.f32.mrf.mxu1  ;;  %v3159_v48 = vpop.f32.mrf.mxu0  ;;  %v1372_v16 = vrot.slane %v1371_v31, 1  ;;  %v1047_v27 = vcombine.low %v3127_v42, %v3129_v33  ;;  %v1024_v56 = vadd.f32 %v1023_v30, %v1022_v13 }
 0x120   : > { %v1376_v61 = vadd.f32 %v1375_v18, %v1374_v0  ;;  %v1033_v4 = vrot.slane %v1032_v6, 4  ;;  %v3164_v5 = vadd.f32 %v1351_v3, %v3117_v32  ;;  %v3166_v26 = vrot.slane %v1048_v7, 7 }
 0x121   : > { %3350 = vst [vmem:[#allocation3_spill] sm:$0xff] %v3155_v58  ;;  %v1664_v53 = vpop.f32.mrf.mxu1  ;;  %v2015_v12 = vpop.f32.mrf.mxu0  ;;  %v3168_v8 = vadd.f32 %v1358_v44, %v1357_v1  ;;  %v1382_v14 = vrot.slane %v1381_v59, 4  ;;  %v1017_v19 = vadd.f32 %v1016_v38, %v1015_v49  ;;  %v1373_v58 = vadd.f32 %v1372_v16, %v1371_v31 }
 0x122   : > { %v1377_v36 = vrot.slane %v1376_v61, 2  ;;  %v1693_v23 = vmul.f32 %v3123_v41, %v2980_v37  ;;  %v1366_v13 = vadd.f32 %v1365_v57, %v1364_v43  ;;  %v1028_v0 = vrot.slane %v1027_v50, 2 }
 0x123   : > { %v1666_v42 = vpop.f32.mrf.mxu1  ;;  %v3172_v33 = vpop.f32.mrf.mxu0  ;;  %v1034_v30 = vadd.f32 %v1033_v4, %v1032_v6  ;;  %v1383_v39 = vadd.f32 %v1382_v14, %v1381_v59  ;;  %v1049_v32 = vcombine.low %v1017_v19, %v1024_v56  ;;  %v1342_v3 = vmul.f32 %v3121_v40, %v2944_v2 }
 0x124   : > { %v1344_v1 = vmul.f32 %v1325_v17, %v2976_v45  ;;  %v1695_v44 = vmul.f32 %v1652_v46, %v3007_v60  ;;  %v1343_v31 = vmul.f32 %v3131_v47, %v2955_v20  ;;  %v1694_v43 = vmul.f32 %v3133_v55, %v2994_v52 }
 0x125   : > { %v3178_v49 = vpop.f32.mrf.mxu1  ;;  %v3180_v7 = vpop.f32.mrf.mxu0  ;;  %v1384_v41 = vrot.slane %v1383_v39, 2  ;;  %v1345_v25 = vmul.f32 %v1327_v29, %v2978_v21  ;;  %v1411_v38 = vcombine.low %v1366_v13, %v1373_v58  ;;  %v1378_v18 = vadd.f32 %v1377_v36, %v1376_v61 }
 0x126   : > { %v1388_v2 = vadd.f32 %v1344_v1, %v1342_v3  ;;  %v1709_v40 = vadd.f32 %v1695_v44, %v1693_v23  ;;  %v1029_v17 = vadd.f32 %v1028_v0, %v1027_v50  ;;  %v1035_v46 = vrot.slane %v1034_v30, 2 }
 0x127   : > { %v3187_v45 = vpop.f32.mrf.mxu0  ;;  %v1385_v6 = vadd.f32 %v1384_v41, %v1383_v39  ;;  %v1395_v57 = vadd.f32 %v1345_v25, %v1343_v31  ;;  %v3191_v16 = vsel %vm684_vm3, %v3166_v26, %v1047_v27  ;;  %v1410_v20 = vcombine.low %v3164_v5, %v3168_v8  ;;  %v3195_v21 = vpop.f32.mrf.mxu1 }
 0x128   : > { %v1389_v47 = vrot.slane %v1388_v2, 4  ;;  %v1710_v55 = vrot.slane %v1709_v40, 4  ;;  %v3199_v58 = vrot.slane %v1049_v32, 6  ;;  %v1696_v56 = vmul.f32 %v3142_v54, %v3024_v24 }
 0x129   : > { %v3197_v29 = vpop.f32.mrf.mxu0  ;;  %v1386_v59 = vrot.slane %v1385_v6, 1  ;;  %v1396_v50 = vrot.slane %v1395_v57, 4  ;;  %v1379_v61 = vrot.slane %v1378_v18, 1  ;;  %v1697_v14 = vmul.f32 %v3147_v35, %v2980_v37  ;;  %v1676_v32 = vpop.f32.mrf.mxu1 }
 0x12a   : > { %v1390_v4 = vadd.f32 %v1389_v47, %v1388_v2  ;;  %v1711_v27 = vadd.f32 %v1710_v55, %v1709_v40  ;;  %v3207_v8 = vrot.slane %v1411_v38, 7  ;;  %v1030_v19 = vrot.slane %v1029_v17, 1 }
 0x12b   : > { %v3205_v5 = vpop.f32.mrf.mxu0  ;;  %v1036_v36 = vadd.f32 %v1035_v46, %v1034_v30  ;;  %v1716_v23 = vadd.f32 %v1696_v56, %v1694_v43  ;;  %v1387_v13 = vadd.f32 %v1386_v59, %v1385_v6  ;;  %v1397_v0 = vadd.f32 %v1396_v50, %v1395_v57 }
 0x12c   : > { %v1698_v39 = vmul.f32 %v3157_v15, %v2994_v52  ;;  %v1699_v54 = vmul.f32 %v1664_v53, %v3007_v60  ;;  %v1391_v1 = vrot.slane %v1390_v4, 2  ;;  %v2056_v35 = vmul.f32 %v3149_v10, %v3030_v28  ;;  %v1678_v10 = vpop.f32.mrf.mxu1 }
 0x12d   : > { %v3212_v3 = vpop.f32.mrf.mxu0  ;;  %v1717_v44 = vrot.slane %v1716_v23, 4  ;;  %v2058_v41 = vmul.f32 %v2015_v12, %v3076_v63  ;;  %v1380_v31 = vadd.f32 %v1379_v61, %v1378_v18  ;;  %v1712_v30 = vrot.slane %v1711_v27, 2 }
 0x12e   : > { %v1723_v43 = vadd.f32 %v1699_v54, %v1697_v14  ;;  %v1700_v25 = vmul.f32 %v1666_v42, %v3024_v24  ;;  %v1037_v15 = vrot.slane %v1036_v36, 1  ;;  %v2057_v53 = vmul.f32 %v3159_v48, %v3073_v34 }
 0x12f   : > { %v3218_v38 = vpop.f32.mrf.mxu0  ;;  %v1718_v2 = vadd.f32 %v1717_v44, %v1716_v23  ;;  %v2072_v40 = vadd.f32 %v2058_v41, %v2056_v35  ;;  %v1412_v46 = vcombine.low %v1380_v31, %v1387_v13  ;;  %v1398_v6 = vrot.slane %v1397_v0, 2 }
 0x130   : > { %v1724_v57 = vrot.slane %v1723_v43, 4  ;;  %v1730_v47 = vadd.f32 %v1700_v25, %v1698_v39  ;;  %v1392_v55 = vadd.f32 %v1391_v1, %v1390_v4  ;;  %v2059_v59 = vmul.f32 %v3172_v33, %v3078_v9 }
 0x131   : > { %v1719_v12 = vrot.slane %v1718_v2, 2  ;;  %v2073_v18 = vrot.slane %v2072_v40, 4  ;;  %v3226_v42 = vsel %vm684_vm3, %v3207_v8, %v1410_v20  ;;  %v1713_v50 = vadd.f32 %v1712_v30, %v1711_v27  ;;  %v3228_v48 = vpop.f32.mrf.mxu0  ;;  %v1682_v20 = vpop.f32.mrf.mxu1 }
 0x132   : > { %v1725_v56 = vadd.f32 %v1724_v57, %v1723_v43  ;;  %v1731_v61 = vrot.slane %v1730_v47, 4  ;;  %v3230_v14 = vadd.f32 %v1030_v19, %v1029_v17  ;;  %v3232_v23 = vadd.f32 %v1037_v15, %v1036_v36 }
 0x133   : > { %v2074_v13 = vadd.f32 %v2073_v18, %v2072_v40  ;;  %v2079_v4 = vadd.f32 %v2059_v59, %v2057_v53  ;;  %v3234_v39 = vrot.slane %v1412_v46, 6  ;;  %v1701_v33 = vmul.f32 %v3178_v49, %v2980_v37  ;;  %v2041_v36 = vpop.f32.mrf.mxu0  ;;  %v1684_v46 = vpop.f32.mrf.mxu1 }
 0x134   : > { %v1726_v54 = vrot.slane %v1725_v56, 2  ;;  %v1732_v1 = vadd.f32 %v1731_v61, %v1730_v47  ;;  %v1393_v44 = vrot.slane %v1392_v55, 1  ;;  %v1399_v27 = vadd.f32 %v1398_v6, %v1397_v0 }
 0x135   : > { %v1720_v35 = vadd.f32 %v1719_v12, %v1718_v2  ;;  %v2080_v41 = vrot.slane %v2079_v4, 4  ;;  %v1714_v31 = vrot.slane %v1713_v50, 1  ;;  %v1702_v17 = vmul.f32 %v3195_v21, %v2994_v52  ;;  %v2045_v59 = vpop.f32.mrf.mxu0 }
 0x136   : > { %v1733_v30 = vrot.slane %v1732_v1, 2  ;;  %v1703_v19 = vmul.f32 %v1676_v32, %v3007_v60  ;;  %v2075_v43 = vrot.slane %v2074_v13, 2  ;;  %v2060_v15 = vmul.f32 %v3180_v7, %v3030_v28 }
 0x137   : > { %v2081_v25 = vadd.f32 %v2080_v41, %v2079_v4  ;;  %v2062_v49 = vmul.f32 %v3197_v29, %v3076_v63  ;;  %v1727_v53 = vadd.f32 %v1726_v54, %v1725_v56  ;;  %v1704_v40 = vmul.f32 %v1678_v10, %v3024_v24 }
 0x138   : > { %v1734_v0 = vadd.f32 %v1733_v30, %v1732_v1  ;;  %v1737_v2 = vadd.f32 %v1703_v19, %v1701_v33  ;;  %v3246_v6 = vadd.f32 %v1393_v44, %v1392_v55  ;;  %v1400_v21 = vrot.slane %v1399_v27, 1  ;;  %v1688_v33 = vpop.f32.mrf.mxu1 }
 0x139   : > { %v1721_v57 = vrot.slane %v1720_v35, 1  ;;  %v2086_v32 = vadd.f32 %v2062_v49, %v2060_v15  ;;  %v2082_v47 = vrot.slane %v2081_v25, 2  ;;  %v2061_v12 = vmul.f32 %v3187_v45, %v3073_v34  ;;  %v2047_v15 = vpop.f32.mrf.mxu0 }
 0x13a   : > { %v1738_v18 = vrot.slane %v1737_v2, 4  ;;  %v1744_v7 = vadd.f32 %v1704_v40, %v1702_v17  ;;  %v3250_v61 = vadd.f32 %v2075_v43, %v2074_v13  ;;  %v1735_v29 = vrot.slane %v1734_v0, 1 }
 0x13b   : > { %v2087_v56 = vrot.slane %v2086_v32, 4  ;;  %v2063_v10 = vmul.f32 %v3205_v5, %v3078_v9  ;;  %v3254_v4 = vadd.f32 %v1714_v31, %v1713_v50  ;;  %v1728_v55 = vrot.slane %v1727_v53, 1 }
 0x13c   : > { %v1739_v54 = vadd.f32 %v1738_v18, %v1737_v2  ;;  %v1745_v1 = vrot.slane %v1744_v7, 4  ;;  %v3256_v44 = vadd.f32 %v1400_v21, %v1399_v27  ;;  %v3258_v41 = vadd.f32 %v1721_v57, %v1720_v35  ;;  %v1690_v21 = vpop.f32.mrf.mxu1 }
 0x13d   : > { %v2088_v45 = vadd.f32 %v2087_v56, %v2086_v32  ;;  %v2093_v30 = vadd.f32 %v2063_v10, %v2061_v12  ;;  %v3260_v17 = vadd.f32 %v2082_v47, %v2081_v25  ;;  %v1705_v43 = vmul.f32 %v1682_v20, %v2980_v37 }
 0x13e   : > { %v1740_v13 = vrot.slane %v1739_v54, 2  ;;  %v1746_v19 = vadd.f32 %v1745_v1, %v1744_v7  ;;  %v2077_v5 = vrot.slane %v3250_v61, 1  ;;  %v1736_v50 = vadd.f32 %v1735_v29, %v1734_v0 }
 0x13f   : > { %v2089_v31 = vrot.slane %v2088_v45, 2  ;;  %v2094_v49 = vrot.slane %v2093_v30, 4  ;;  %v1729_v2 = vadd.f32 %v1728_v55, %v1727_v53  ;;  %v2064_v27 = vmul.f32 %v3212_v3, %v3030_v28  ;;  %v2051_v53 = vpop.f32.mrf.mxu0 }
 0x140   : > { %v1747_v40 = vrot.slane %v1746_v19, 2  ;;  %v1707_v35 = vmul.f32 %v1688_v33, %v3007_v60  ;;  %v1741_v25 = vadd.f32 %v1740_v13, %v1739_v54  ;;  %v1706_v32 = vmul.f32 %v1684_v46, %v2994_v52 }
 0x141   : > { %v2095_v57 = vadd.f32 %v2094_v49, %v2093_v30  ;;  %v2066_v37 = vmul.f32 %v3228_v48, %v3076_v63  ;;  %v2084_v20 = vrot.slane %v3260_v17, 1  ;;  %v2090_v0 = vadd.f32 %v2089_v31, %v2088_v45  ;;  %v2053_v13 = vpop.f32.mrf.mxu0 }
 0x142   : > { %v1748_v47 = vadd.f32 %v1747_v40, %v1746_v19  ;;  %v1751_v12 = vadd.f32 %v1707_v35, %v1705_v43  ;;  %v1774_v18 = vcombine.low %v1729_v2, %v1736_v50  ;;  %v1708_v3 = vmul.f32 %v1690_v21, %v3024_v24 }
 0x143   : > { %v2096_v7 = vrot.slane %v2095_v57, 2  ;;  %v2100_v29 = vadd.f32 %v2066_v37, %v2064_v27  ;;  %v2065_v56 = vmul.f32 %v3218_v38, %v3073_v34  ;;  %v2067_v52 = vmul.f32 %v2041_v36, %v3078_v9 }
 0x144   : > { %v1749_v60 = vrot.slane %v1748_v47, 1  ;;  %v1752_v10 = vrot.slane %v1751_v12, 4  ;;  %v1742_v46 = vrot.slane %v1741_v25, 1  ;;  %v1758_v54 = vadd.f32 %v1708_v3, %v1706_v32 }
 0x145   : > { %v2097_v48 = vadd.f32 %v2096_v7, %v2095_v57  ;;  %v2101_v55 = vrot.slane %v2100_v29, 4  ;;  %v2091_v1 = vrot.slane %v2090_v0, 1  ;;  %v2107_v30 = vadd.f32 %v2067_v52, %v2065_v56 }
 0x146   : > { %v1750_v33 = vadd.f32 %v1749_v60, %v1748_v47  ;;  %v1753_v45 = vadd.f32 %v1752_v10, %v1751_v12  ;;  %v1759_v50 = vrot.slane %v1758_v54, 4  ;;  %v2068_v24 = vmul.f32 %v2045_v59, %v3030_v28 }
 0x147   : > { %v2098_v19 = vrot.slane %v2097_v48, 1  ;;  %v2102_v43 = vadd.f32 %v2101_v55, %v2100_v29  ;;  %v2108_v49 = vrot.slane %v2107_v30, 4  ;;  %v2069_v38 = vmul.f32 %v2047_v15, %v3073_v34 }
 0x148   : > { %v1754_v31 = vrot.slane %v1753_v45, 2  ;;  %v2070_v36 = vmul.f32 %v2051_v53, %v3076_v63  ;;  %v1760_v27 = vadd.f32 %v1759_v50, %v1758_v54  ;;  %v2071_v35 = vmul.f32 %v2053_v13, %v3078_v9 }
 0x149   : > { %v2099_v2 = vadd.f32 %v2098_v19, %v2097_v48  ;;  %v2103_v40 = vrot.slane %v2102_v43, 2  ;;  %v1743_v21 = vadd.f32 %v1742_v46, %v1741_v25  ;;  %v2109_v32 = vadd.f32 %v2108_v49, %v2107_v30 }
 0x14a   : > { %v1755_v57 = vadd.f32 %v1754_v31, %v1753_v45  ;;  %v2114_v37 = vadd.f32 %v2070_v36, %v2068_v24  ;;  %v2092_v47 = vadd.f32 %v2091_v1, %v2090_v0  ;;  %v1761_v7 = vrot.slane %v1760_v27, 2 }
 0x14b   : > { %v2104_v12 = vadd.f32 %v2103_v40, %v2102_v43  ;;  %v2121_v28 = vadd.f32 %v2071_v35, %v2069_v38  ;;  %v1777_v59 = vrot.slane %v1774_v18, 7  ;;  %v1775_v29 = vcombine.low %v1743_v21, %v1750_v33 }
 0x14c   : > { %v2110_v34 = vrot.slane %v2109_v32, 2  ;;  %v2115_v15 = vrot.slane %v2114_v37, 4  ;;  %v2137_v63 = vcombine.low %v2092_v47, %v2099_v2  ;;  %v1756_v53 = vrot.slane %v1755_v57, 1 }
 0x14d   : > { %v1762_v3 = vadd.f32 %v1761_v7, %v1760_v27  ;;  %v2122_v60 = vrot.slane %v2121_v28, 4  ;;  %v1773_v9 = vcombine.low %v3254_v4, %v3258_v41  ;;  %v2105_v25 = vrot.slane %v2104_v12, 1 }
 0x14e   : > { %v2111_v56 = vadd.f32 %v2110_v34, %v2109_v32  ;;  %v2116_v0 = vadd.f32 %v2115_v15, %v2114_v37  ;;  %v2078_v10 = vadd.f32 %v2077_v5, %v3250_v61  ;;  %v2085_v18 = vadd.f32 %v2084_v20, %v3260_v17 }
 0x14f   : > { %v1763_v52 = vrot.slane %v1762_v3, 1  ;;  %v2123_v46 = vadd.f32 %v2122_v60, %v2121_v28  ;;  %v1778_v48 = vsel %vm684_vm3, %v1777_v59, %v1773_v9  ;;  %v1780_v55 = vrot.slane %v1775_v29, 6 }
 0x150   : > { %v2112_v54 = vrot.slane %v2111_v56, 1  ;;  %v2117_v1 = vrot.slane %v2116_v0, 2  ;;  %v2140_v33 = vrot.slane %v2137_v63, 7  ;;  %v1757_v45 = vadd.f32 %v1756_v53, %v1755_v57 }
 0x151   : > { %v1764_v4 = vadd.f32 %v1763_v52, %v1762_v3  ;;  %v2124_v41 = vrot.slane %v2123_v46, 2  ;;  %v2106_v30 = vadd.f32 %v2105_v25, %v2104_v12  ;;  %v682_v61 = vcombine.low %v3107_v51, %v3125_v11  ;;  %v2256_v52 = vpop.permute.xlu0 %2255 }
 0x152   : > { %v2113_v13 = vadd.f32 %v2112_v54, %v2111_v56  ;;  %v2118_v19 = vadd.f32 %v2117_v1, %v2116_v0  ;;  %v2136_v5 = vcombine.low %v2078_v10, %v2085_v18  ;;  %v1413_v20 = vcombine.low %v3246_v6, %v3256_v44  ;;  %v3351_v6 = vld [vmem:[#allocation3_spill] sm:$0xff] }
 0x153   : > { %v2125_v17 = vadd.f32 %v2124_v41, %v2123_v46  ;;  %v1776_v43 = vcombine.low %v1757_v45, %v1764_v4  ;;  %v1416_v31 = vsel %vm686_vm4, %v3207_v8, %v3226_v42  ;;  %v1779_v49 = vsel %vm686_vm4, %v1777_v59, %v1778_v48  ;;  %v2157_v18 = vld [vmem:[%s3344_s4] sm:$0xff] }
 0x154   : > { %v2138_v50 = vcombine.low %v2106_v30, %v2113_v13  ;;  %v2119_v24 = vrot.slane %v2118_v19, 1  ;;  %v2141_v38 = vsel %vm684_vm3, %v2140_v33, %v2136_v5  ;;  %v1781_v2 = vsel %vm689_vm5, %v1780_v55, %v1779_v49 }
 0x155   : > { %v2126_v36 = vrot.slane %v2125_v17, 1  ;;  %v687_v51 = vsel %vm686_vm4, %v3088_v62, %v3101_v22  ;;  %v693_v40 = vrot.slane %v682_v61, 5  ;;  %v1050_v27 = vcombine.low %v3230_v14, %v3232_v23 }
 0x156   : > { %v2143_v11 = vrot.slane %v2138_v50, 6  ;;  %v690_v44 = vsel %vm689_vm5, %v3351_v6, %v687_v51  ;;  %v2120_v8 = vadd.f32 %v2119_v24, %v2118_v19  ;;  %v1783_v35 = vrot.slane %v1776_v43, 5 }
 0x157   : > { %v2127_v42 = vadd.f32 %v2126_v36, %v2125_v17  ;;  %v692_v21 = vsel %vm691_vm6, %v3351_v6, %v690_v44  ;;  %v2142_v57 = vsel %vm686_vm4, %v2140_v33, %v2141_v38  ;;  %v1418_v32 = vsel %vm689_vm5, %v3234_v39, %v1416_v31 }
 0x158   : > { %v695_v62 = vsel %vm694_vm7, %v693_v40, %v692_v21  ;;  %v1053_v22 = vsel %vm686_vm4, %v3166_v26, %v3191_v16  ;;  %v2144_v14 = vsel %vm689_vm5, %v2143_v11, %v2142_v57  ;;  %v1420_v23 = vrot.slane %v1413_v20, 5 }
 0x159   : > { %v2139_v37 = vcombine.low %v2120_v8, %v2127_v42  ;;  %v1055_v47 = vsel %vm689_vm5, %v3199_v58, %v1053_v22  ;;  %v1782_v12 = vsel %vm691_vm6, %v1780_v55, %v1781_v2  ;;  %v697_v7 = vsel %vm696_vm8, %v693_v40, %v695_v62  ;;  %v2264_v55 = vpop.permute.xlu0 %2263 }
 0x15a   : > { %v1057_v28 = vrot.slane %v1050_v27, 5  ;;  %v1784_v29 = vsel %vm694_vm7, %v1783_v35, %v1782_v12  ;;  %v2145_v34 = vsel %vm691_vm6, %v2143_v11, %v2144_v14  ;;  %v1419_v26 = vsel %vm691_vm6, %v3234_v39, %v1418_v32 }
 0x15b   : > { %v2146_v59 = vrot.slane %v2139_v37, 5  ;;  %v1056_v16 = vsel %vm691_vm6, %v3199_v58, %v1055_v47  ;;  %v1421_v63 = vsel %vm694_vm7, %v1420_v23, %v1419_v26  ;;  %v1785_v60 = vsel %vm696_vm8, %v1783_v35, %v1784_v29 }
 0x15c   : > { %v1058_v53 = vsel %vm694_vm7, %v1057_v28, %v1056_v16  ;;  %v1422_v25 = vsel %vm696_vm8, %v1420_v23, %v1421_v63 }
 0x15d   : > { %v2147_v15 = vsel %vm694_vm7, %v2146_v59, %v2145_v34  ;;  %v1059_v56 = vsel %vm696_vm8, %v1057_v28, %v1058_v53  ;;  %v2166_v39 = vcombine.high %v1422_v25, %v1785_v60  ;;  %v2165_v58 = vcombine.low %v1422_v25, %v1785_v60 }
 0x15e   : > { %v2148_v3 = vsel %vm696_vm8, %v2146_v59, %v2147_v15  ;;  %v2164_v0 = vcombine.high %v697_v7, %v1059_v56  ;;  %v2163_v10 = vcombine.low %v697_v7, %v1059_v56 }
 0x15f   : > { %v2167_v9 = vcombine.high %v2148_v3, %v2148_v3 }
 0x161   : > { %2419 = vmatprep.subr.msk.mxu1 %vm2176_vm9, %v2167_v9 }
 0x162   : > { %2420 = vmatpush1.msk.msra.mxu1 %vm2176_vm9, %v2148_v3 }
 0x163   : > { %2209 = vmatprep.subr.mxu1 %v2166_v39 }
 0x164   : > { %2210 = vmatpush1.msra.mxu1 %v2165_v58 }
 0x165   : > { %2211 = vmatprep.subr.mxu1 %v2164_v0 }
 0x166   : > { %2212 = vmatpush1.msra.mxu1 %v2163_v10 }
 0x167   : > { %2421 = vmatmul.mubr.msk.f32.vlgmr.msra.gmra.mxu1 %vm2172_vm10, %v2157_v18 }
 0x227   : > { %v2247_v46 = vpop.f32.mrf.mxu1 }
 0x228   : > { %v2258_v48 = vmul.f32 %v2256_v52, %v2247_v46 }
 0x229   : > { %v2249_v54 = vpop.f32.mrf.mxu1 }
 0x22a   : > { %v2266_v1 = vadd.f32 %v2264_v55, %v2258_v48  ;;  %v2259_v33 = vmul.f32 %v2256_v52, %v2249_v54 }
 0x22c   : > { %v2422_v45 = vmul.f32 -1.442695, %v2266_v1  ;;  %v2267_v4 = vadd.f32 %v2264_v55, %v2259_v33 }
 0x22e   : > { %2484 = vpow2.f32 %v2422_v45  ;;  %v2423_v41 = vmul.f32 -1.442695, %v2267_v4 }
 0x230   : > { %2486 = vpow2.f32 %v2423_v41 }
 0x23b   : > { %v2485_v30 = vpop.eup %2484 }
 0x23c   : > { %v2274_v13 = vadd.f32 1.0, %v2485_v30 }
 0x23d   : > { %v2487_v19 = vpop.eup %2486 }
 0x23e   : > { %2488 = vrcp.f32 %v2274_v13  ;;  %v2275_v61 = vadd.f32 1.0, %v2487_v19 }
 0x240   : > { %2490 = vrcp.f32 %v2275_v61 }
 0x24b   : > { %v2489_v5 = vpop.eup %2488 }
 0x24c   : > { %v2280_v17 = vmul.f32 %v2489_v5, %v2266_v1 }
 0x24d   : > { %v2491_v20 = vpop.eup %2490 }
 0x24e   : > { %2282 = vst [vmem:[%s298_s19] sm:$0xff] %v2280_v17  ;;  %v2281_v43 = vmul.f32 %v2491_v20, %v2267_v4 }
 0x250   : > { %2283 = vst [vmem:[%s298_s19 + $0x8] sm:$0xff] %v2281_v43 }
 0x251 PF: > { %s17_s24 = sadd.s32 1, %s2498_s24  }
 0x252   : > { %p14_p4 = scmp.ge.s32.totalorder %s17_s24, 4  }
 0x254   :  { %16 = sbr.rel (!%p14_p4) target bundleno = 1 (0x1), region = 102 }

</bundles_post_ra>
